<compile_context>
chip_gen: v5e
topology: v5e:2x2
jax: 0.10.0
libtpu: 0.0.40
codegen_flags: <defaults>
</compile_context>

<pallas_src>
import functools

import jax
import jax.numpy as jnp
from jax.experimental import pallas as pl
from jax.experimental.pallas import tpu as pltpu


def _round_up(a, b):
    return ((a + b - 1) // b) * b


# ----------------------------------------------------------------------------
# Fused Pallas kernel: [conv3x3(pad=1) -> InstanceNorm2d -> LeakyReLU] x 2
# ----------------------------------------------------------------------------
def _fused_decoder_kernel(x_ref, w1_ref, w2_ref, mask_ref, o_ref, xp_ref,
                          *, H, W, Cmid, Cout, pad_lo, L_pad):
    # x_ref   : (1, Cin, bufw) bf16  pre-haloed payload: [0:pad_lo) zeros,
    #           H rows of (W valid + 2 zero cols), trailing zeros to bufw.
    # w1_ref  : (9, Cmid, Cin) bf16  per-tap conv weights (t = ky*3 + kx)
    # w2_ref  : (9, Cout, Cmid) bf16
    # mask_ref: (1, L_pad) f32       1.0 on the H*W valid columns
    # o_ref   : (1, Cout, L_pad) f32 lane-dense output (Wp-strided rows)
    # xp_ref  : (Cmid, bufw) bf16    zero-haloed stage-1 activation buffer
    Wp = W + 2
    inv_hw = 1.0 / float(H * W)
    bufw = xp_ref.shape[1]
    mask = mask_ref[...]                                     # (1, L_pad)

    def conv_in_lrelu(load_view, w_ref, cout):
        # 3x3 conv as 9 accumulated MXU dots (no materialized im2col buffer).
        acc = None
        for t in range(9):
            dy, dx = t // 3, t % 3
            off = (dy - 1) * Wp + (dx - 1)
            d = jnp.dot(w_ref[t], load_view(off),
                        preferred_element_type=jnp.float32)  # (cout, L_pad)
            acc = d if acc is None else acc + d
        # InstanceNorm2d (affine=False, eps=1e-5): stats over the H*W valid cols.
        mean = jnp.sum(acc * mask, axis=-1, keepdims=True) * inv_hw
        dlt = (acc - mean) * mask                            # invalid cols -> 0
        var = jnp.sum(dlt * dlt, axis=-1, keepdims=True) * inv_hw
        h = dlt * jax.lax.rsqrt(var + 1e-5)
        # LeakyReLU(0.01); LeakyReLU(0) == 0, so invalid columns stay exactly 0
        # and the result is directly reusable as a zero-haloed payload.
        return jnp.where(h >= 0, h, 0.01 * h)

    # ---- stage 1: reads directly from the pre-haloed input block.
    h1 = conv_in_lrelu(
        lambda off: x_ref[0, :, pad_lo + off:pad_lo + off + L_pad],
        w1_ref, Cmid)

    # ---- stage 2: stage-1 activations staged (bf16) into the haloed scratch.
    # Only the small halo margins need clearing (aligned, cheap); the payload
    # region is overwritten and its own pad columns are already exactly zero.
    xp_ref[:, 0:pad_lo] = jnp.zeros((Cmid, pad_lo), xp_ref.dtype)
    xp_ref[:, pad_lo + L_pad:] = jnp.zeros(
        (Cmid, bufw - pad_lo - L_pad), xp_ref.dtype)
    xp_ref[:, pad_lo:pad_lo + L_pad] = h1.astype(xp_ref.dtype)

    h2 = conv_in_lrelu(
        lambda off: xp_ref[:, pad_lo + off:pad_lo + off + L_pad],
        w2_ref, Cout)
    o_ref[0] = h2.astype(o_ref.dtype)


def _fused_conv_in_lrelu_x2(g, w1_9, w2_9, mask, *, H, W, Cin, Cmid, Cout,
                            pad_lo, L_pad, bufw):
    N = g.shape[0]

    kernel = functools.partial(
        _fused_decoder_kernel, H=H, W=W, Cmid=Cmid, Cout=Cout,
        pad_lo=pad_lo, L_pad=L_pad)

    flops = 2 * N * H * W * 9 * (Cin * Cmid + Cmid * Cout)
    bytes_accessed = (2 * (g.size + w1_9.size + w2_9.size)
                      + 4 * (mask.size + N * Cout * L_pad))

    # VMEM budget derived from the actual buffers: double-buffered in/out
    # blocks + scratch + a conservative allowance for the traced f32 working
    # set (accumulators / h1 / shifted views).  Capped for v7x's 64 MiB.
    need = (2 * Cin * bufw * 2
            + 2 * 9 * Cmid * Cin * 2
            + 2 * 9 * Cout * Cmid * 2
            + 2 * L_pad * 4
            + 2 * Cout * L_pad * 4
            + Cmid * bufw * 2
            + 6 * max(Cin, Cmid, Cout) * L_pad * 4)
    vmem_limit = int(min(56 << 20, max(16 << 20, 2 * need + (4 << 20))))

    return pl.pallas_call(
        kernel,
        out_shape=jax.ShapeDtypeStruct((N, Cout, L_pad), jnp.float32),
        grid_spec=pltpu.PrefetchScalarGridSpec(
            num_scalar_prefetch=0,
            grid=(N,),
            in_specs=[
                pl.BlockSpec((1, Cin, bufw), lambda n: (n, 0, 0)),
                pl.BlockSpec((9, Cmid, Cin), lambda n: (0, 0, 0)),
                pl.BlockSpec((9, Cout, Cmid), lambda n: (0, 0, 0)),
                pl.BlockSpec((1, L_pad), lambda n: (0, 0)),
            ],
            out_specs=pl.BlockSpec((1, Cout, L_pad), lambda n: (n, 0, 0)),
            scratch_shapes=[
                pltpu.VMEM((Cmid, bufw), jnp.bfloat16),   # zero-haloed h1 buffer
            ],
        ),
        compiler_params=pltpu.CompilerParams(
            dimension_semantics=("parallel",),            # batch shards across TCs
            vmem_limit_bytes=vmem_limit,
        ),
        cost_estimate=pl.CostEstimate(
            flops=int(flops),
            transcendentals=int(N * (Cmid + Cout)),
            bytes_accessed=int(bytes_accessed)),
    )(g, w1_9, w2_9, mask)


# ----------------------------------------------------------------------------
# Glue: bilinear x2 upsample (align_corners=True, NCHW) + concat + layout prep
# ----------------------------------------------------------------------------
def upsample_bilinear_x2_align_corners(x):
    # NCHW; matches F.interpolate(scale_factor=2, mode='bilinear', align_corners=True)
    N, C, H, W = x.shape
    Ho, Wo = 2 * H, 2 * W

    def src(out_size, in_size):
        if in_size == 1 or out_size == 1:
            return jnp.zeros((out_size,), jnp.float32)
        return jnp.arange(out_size, dtype=jnp.float32) * (
            (in_size - 1) / (out_size - 1))

    ys, xs = src(Ho, H), src(Wo, W)
    y0 = jnp.clip(jnp.floor(ys).astype(jnp.int32), 0, H - 1)
    y1 = jnp.minimum(y0 + 1, H - 1)
    wy = (ys - y0.astype(jnp.float32))[None, None, :, None]
    x0 = jnp.clip(jnp.floor(xs).astype(jnp.int32), 0, W - 1)
    x1 = jnp.minimum(x0 + 1, W - 1)
    wx = (xs - x0.astype(jnp.float32))[None, None, None, :]

    top = x[:, :, y0, :] * (1.0 - wy) + x[:, :, y1, :] * wy
    return top[:, :, :, x0] * (1.0 - wx) + top[:, :, :, x1] * wx


def decoder_layer_forward(x, y, w1_oihw, b1, w2_oihw, b2):
    """x: (N, Cx, H, W), y: (N, Cy, 2H, 2W)  ->  (N, Cout, 2H, 2W), all NCHW.

    b1 / b2 are accepted for interface parity with the PyTorch module but are
    NOT applied in the kernel: a conv bias immediately followed by affine-free
    InstanceNorm2d is exactly cancelled by the mean subtraction.
    """
    del b1, b2
    x_up = upsample_bilinear_x2_align_corners(x)
    xc = jnp.concatenate([x_up, y], axis=1)                  # (N, Cin, Ho, Wo)
    N, Cin, Ho, Wo = xc.shape
    Cmid, Cout = w1_oihw.shape[0], w2_oihw.shape[0]

    Wp = Wo + 2
    L = Ho * Wp
    L_pad = _round_up(L, 128)
    pad_lo = _round_up(Wp + 1, 128)
    bufw = _round_up(pad_lo + L_pad + Wp + 1, 128)

    # Pre-haloed, Wp-strided, lane-padded bf16 payload built directly in HBM
    # (fuses into the upsample/concat producer): [0:pad_lo) zeros | Ho rows of
    # (Wo valid + 2 zero cols) | zeros up to bufw.
    g = jnp.pad(xc, ((0, 0), (0, 0), (0, 0), (0, 2))).reshape(N, Cin, L)
    g = jnp.pad(g, ((0, 0), (0, 0), (pad_lo, bufw - pad_lo - L)))
    g = g.astype(jnp.bfloat16)

    # Validity mask over the lane-padded working layout (pad cols / lane
    # padding excluded from the InstanceNorm statistics).
    idx = jnp.arange(L_pad, dtype=jnp.int32)
    mask = (((idx % Wp) < Wo) & (idx < L)).astype(jnp.float32).reshape(1, L_pad)

    # Per-tap weight layout: w9[t, o, c] = w_oihw[o, c, t // 3, t % 3], bf16.
    w1_9 = jnp.transpose(w1_oihw, (2, 3, 0, 1)).reshape(9, Cmid, Cin)
    w2_9 = jnp.transpose(w2_oihw, (2, 3, 0, 1)).reshape(9, Cout, Cmid)
    w1_9 = w1_9.astype(jnp.bfloat16)
    w2_9 = w2_9.astype(jnp.bfloat16)

    out_flat = _fused_conv_in_lrelu_x2(
        g, w1_9, w2_9, mask, H=Ho, W=Wo, Cin=Cin, Cmid=Cmid, Cout=Cout,
        pad_lo=pad_lo, L_pad=L_pad, bufw=bufw)

    # Undo the lane-dense working layout (single slice in glue).
    # TODO(synk): keep the (N, Cout, L_pad) layout for a fused downstream
    # consumer to avoid this extra HBM pass.
    return out_flat[:, :, :L].reshape(N, Cout, Ho, Wp)[:, :, :, :Wo]


# ----------------------------------------------------------------------------
# Pure-JAX reference (sanity check; keeps the conv bias to show it is a no-op)
# ----------------------------------------------------------------------------
def _ref_conv_block(x, w_oihw, b):
    y = jax.lax.conv_general_dilated(
        x, w_oihw, window_strides=(1, 1), padding="SAME",
        dimension_numbers=("NCHW", "OIHW", "NCHW"))
    y = y + b.reshape(1, -1, 1, 1)
    mean = y.mean(axis=(2, 3), keepdims=True)
    var = ((y - mean) ** 2).mean(axis=(2, 3), keepdims=True)
    y = (y - mean) / jnp.sqrt(var + 1e-5)
    return jnp.where(y >= 0, y, 0.01 * y)


def _ref_forward(x, y, w1_oihw, b1, w2_oihw, b2):
    xc = jnp.concatenate([upsample_bilinear_x2_align_corners(x), y], axis=1)
    out = _ref_conv_block(xc, w1_oihw, b1)
    out = _ref_conv_block(out, w2_oihw, b2)
    return out


if __name__ == "__main__":
    # DecoderLayer(in_channels=8, mid_channels=8, out_channels=4, bias=True)
    #   x: (2, 4, 8, 8) -> upsampled to 16x16; y: (2, 4, 16, 16)
    N, Cx, Cy, H0, W0 = 2, 4, 4, 8, 8
    in_ch, mid_ch, out_ch = Cx + Cy, 8, 4

    key = jax.random.PRNGKey(0)
    k1, k2, k3, k4, k5, k6 = jax.random.split(key, 6)
    x = jax.random.normal(k1, (N, Cx, H0, W0), jnp.float32)
    y = jax.random.normal(k2, (N, Cy, 2 * H0, 2 * W0), jnp.float32)

    w1_oihw = 0.1 * jax.random.normal(k3, (mid_ch, in_ch, 3, 3), jnp.float32)
    w2_oihw = 0.1 * jax.random.normal(k4, (out_ch, mid_ch, 3, 3), jnp.float32)
    b1 = 0.1 * jax.random.normal(k5, (mid_ch,), jnp.float32)
    b2 = 0.1 * jax.random.normal(k6, (out_ch,), jnp.float32)

    fwd = jax.jit(decoder_layer_forward)
    out = jax.block_until_ready(fwd(x, y, w1_oihw, b1, w2_oihw, b2))
    assert out.shape == (N, out_ch, 2 * H0, 2 * W0), out.shape

    ref = jax.block_until_ready(_ref_forward(x, y, w1_oihw, b1, w2_oihw, b2))
    max_err = float(jnp.max(jnp.abs(out - ref)))
    # bf16 MXU operands vs the f32 reference -> loosened tolerance.
    assert jnp.allclose(out, ref, atol=5e-2, rtol=5e-2), max_err

    print("KERNEL_OK")
</pallas_src>

<mosaic_0001>
module attributes {stable_mosaic.version = 11 : i64} {
  func.func @_fused_decoder_kernel(%arg0: i32, %arg1: memref<1x8x640xbf16, #tpu.memory_space<vmem>>, %arg2: memref<9x8x8xbf16, #tpu.memory_space<vmem>>, %arg3: memref<9x4x8xbf16, #tpu.memory_space<vmem>>, %arg4: memref<1x384xf32, #tpu.memory_space<vmem>>, %arg5: memref<1x4x384xf32, #tpu.memory_space<vmem>>, %arg6: memref<8x640xbf16, #tpu.memory_space<vmem>>) attributes {dimension_semantics = [#tpu.dimension_semantics<parallel>], iteration_bounds = array<i64: 2>, scalar_prefetch = 0 : i64, scratch_operands = 1 : i64, tpu.core_type = #tpu.core_type<tc>, window_params = [{transform_indices = @transform_0, window_bounds = array<i64: 1, 8, 640>}, {pipeline_mode = #tpu.pipeline_mode<synchronous>, transform_indices = @transform_1, window_bounds = array<i64: 9, 8, 8>}, {pipeline_mode = #tpu.pipeline_mode<synchronous>, transform_indices = @transform_2, window_bounds = array<i64: 9, 4, 8>}, {pipeline_mode = #tpu.pipeline_mode<synchronous>, transform_indices = @transform_3, window_bounds = array<i64: 1, 384>}, {transform_indices = @transform_4, window_bounds = array<i64: 1, 4, 384>}]} {
    %c0 = arith.constant 0 : index
    %c0_0 = arith.constant 0 : index
    %0 = vector.load %arg4[%c0, %c0_0] : memref<1x384xf32, #tpu.memory_space<vmem>>, vector<1x384xf32>
    %c0_1 = arith.constant 0 : index
    %c0_2 = arith.constant 0 : index
    %c0_3 = arith.constant 0 : index
    %1 = vector.load %arg2[%c0_1, %c0_2, %c0_3] : memref<9x8x8xbf16, #tpu.memory_space<vmem>>, vector<1x8x8xbf16>
    %2 = vector.shape_cast %1 : vector<1x8x8xbf16> to vector<8x8xbf16>
    %c0_4 = arith.constant 0 : index
    %c0_5 = arith.constant 0 : index
    %c109 = arith.constant 109 : index
    %3 = vector.load %arg1[%c0_4, %c0_5, %c109] : memref<1x8x640xbf16, #tpu.memory_space<vmem>>, vector<1x8x384xbf16>
    %4 = vector.shape_cast %3 : vector<1x8x384xbf16> to vector<8x384xbf16>
    %cst = arith.constant dense<0.000000e+00> : vector<8x384xf32>
    %5 = tpu.matmul %2, %4, %cst {dimension_numbers = #tpu.dot_dimension_numbers<[1], [0], [0], [1], [0, 0, 1, 1], [], []>} : vector<8x8xbf16>, vector<8x384xbf16>, vector<8x384xf32> -> vector<8x384xf32>
    %c1 = arith.constant 1 : index
    %c0_6 = arith.constant 0 : index
    %c0_7 = arith.constant 0 : index
    %6 = vector.load %arg2[%c1, %c0_6, %c0_7] : memref<9x8x8xbf16, #tpu.memory_space<vmem>>, vector<1x8x8xbf16>
    %7 = vector.shape_cast %6 : vector<1x8x8xbf16> to vector<8x8xbf16>
    %c0_8 = arith.constant 0 : index
    %c0_9 = arith.constant 0 : index
    %c110 = arith.constant 110 : index
    %8 = vector.load %arg1[%c0_8, %c0_9, %c110] : memref<1x8x640xbf16, #tpu.memory_space<vmem>>, vector<1x8x384xbf16>
    %9 = vector.shape_cast %8 : vector<1x8x384xbf16> to vector<8x384xbf16>
    %cst_10 = arith.constant dense<0.000000e+00> : vector<8x384xf32>
    %10 = tpu.matmul %7, %9, %cst_10 {dimension_numbers = #tpu.dot_dimension_numbers<[1], [0], [0], [1], [0, 0, 1, 1], [], []>} : vector<8x8xbf16>, vector<8x384xbf16>, vector<8x384xf32> -> vector<8x384xf32>
    %11 = arith.addf %5, %10 : vector<8x384xf32>
    %c2 = arith.constant 2 : index
    %c0_11 = arith.constant 0 : index
    %c0_12 = arith.constant 0 : index
    %12 = vector.load %arg2[%c2, %c0_11, %c0_12] : memref<9x8x8xbf16, #tpu.memory_space<vmem>>, vector<1x8x8xbf16>
    %13 = vector.shape_cast %12 : vector<1x8x8xbf16> to vector<8x8xbf16>
    %c0_13 = arith.constant 0 : index
    %c0_14 = arith.constant 0 : index
    %c111 = arith.constant 111 : index
    %14 = vector.load %arg1[%c0_13, %c0_14, %c111] : memref<1x8x640xbf16, #tpu.memory_space<vmem>>, vector<1x8x384xbf16>
    %15 = vector.shape_cast %14 : vector<1x8x384xbf16> to vector<8x384xbf16>
    %cst_15 = arith.constant dense<0.000000e+00> : vector<8x384xf32>
    %16 = tpu.matmul %13, %15, %cst_15 {dimension_numbers = #tpu.dot_dimension_numbers<[1], [0], [0], [1], [0, 0, 1, 1], [], []>} : vector<8x8xbf16>, vector<8x384xbf16>, vector<8x384xf32> -> vector<8x384xf32>
    %17 = arith.addf %11, %16 : vector<8x384xf32>
    %c3 = arith.constant 3 : index
    %c0_16 = arith.constant 0 : index
    %c0_17 = arith.constant 0 : index
    %18 = vector.load %arg2[%c3, %c0_16, %c0_17] : memref<9x8x8xbf16, #tpu.memory_space<vmem>>, vector<1x8x8xbf16>
    %19 = vector.shape_cast %18 : vector<1x8x8xbf16> to vector<8x8xbf16>
    %c0_18 = arith.constant 0 : index
    %c0_19 = arith.constant 0 : index
    %c127 = arith.constant 127 : index
    %20 = vector.load %arg1[%c0_18, %c0_19, %c127] : memref<1x8x640xbf16, #tpu.memory_space<vmem>>, vector<1x8x384xbf16>
    %21 = vector.shape_cast %20 : vector<1x8x384xbf16> to vector<8x384xbf16>
    %cst_20 = arith.constant dense<0.000000e+00> : vector<8x384xf32>
    %22 = tpu.matmul %19, %21, %cst_20 {dimension_numbers = #tpu.dot_dimension_numbers<[1], [0], [0], [1], [0, 0, 1, 1], [], []>} : vector<8x8xbf16>, vector<8x384xbf16>, vector<8x384xf32> -> vector<8x384xf32>
    %23 = arith.addf %17, %22 : vector<8x384xf32>
    %c4 = arith.constant 4 : index
    %c0_21 = arith.constant 0 : index
    %c0_22 = arith.constant 0 : index
    %24 = vector.load %arg2[%c4, %c0_21, %c0_22] : memref<9x8x8xbf16, #tpu.memory_space<vmem>>, vector<1x8x8xbf16>
    %25 = vector.shape_cast %24 : vector<1x8x8xbf16> to vector<8x8xbf16>
    %c0_23 = arith.constant 0 : index
    %c0_24 = arith.constant 0 : index
    %c128 = arith.constant 128 : index
    %26 = vector.load %arg1[%c0_23, %c0_24, %c128] : memref<1x8x640xbf16, #tpu.memory_space<vmem>>, vector<1x8x384xbf16>
    %27 = vector.shape_cast %26 : vector<1x8x384xbf16> to vector<8x384xbf16>
    %cst_25 = arith.constant dense<0.000000e+00> : vector<8x384xf32>
    %28 = tpu.matmul %25, %27, %cst_25 {dimension_numbers = #tpu.dot_dimension_numbers<[1], [0], [0], [1], [0, 0, 1, 1], [], []>} : vector<8x8xbf16>, vector<8x384xbf16>, vector<8x384xf32> -> vector<8x384xf32>
    %29 = arith.addf %23, %28 : vector<8x384xf32>
    %c5 = arith.constant 5 : index
    %c0_26 = arith.constant 0 : index
    %c0_27 = arith.constant 0 : index
    %30 = vector.load %arg2[%c5, %c0_26, %c0_27] : memref<9x8x8xbf16, #tpu.memory_space<vmem>>, vector<1x8x8xbf16>
    %31 = vector.shape_cast %30 : vector<1x8x8xbf16> to vector<8x8xbf16>
    %c0_28 = arith.constant 0 : index
    %c0_29 = arith.constant 0 : index
    %c129 = arith.constant 129 : index
    %32 = vector.load %arg1[%c0_28, %c0_29, %c129] : memref<1x8x640xbf16, #tpu.memory_space<vmem>>, vector<1x8x384xbf16>
    %33 = vector.shape_cast %32 : vector<1x8x384xbf16> to vector<8x384xbf16>
    %cst_30 = arith.constant dense<0.000000e+00> : vector<8x384xf32>
    %34 = tpu.matmul %31, %33, %cst_30 {dimension_numbers = #tpu.dot_dimension_numbers<[1], [0], [0], [1], [0, 0, 1, 1], [], []>} : vector<8x8xbf16>, vector<8x384xbf16>, vector<8x384xf32> -> vector<8x384xf32>
    %35 = arith.addf %29, %34 : vector<8x384xf32>
    %c6 = arith.constant 6 : index
    %c0_31 = arith.constant 0 : index
    %c0_32 = arith.constant 0 : index
    %36 = vector.load %arg2[%c6, %c0_31, %c0_32] : memref<9x8x8xbf16, #tpu.memory_space<vmem>>, vector<1x8x8xbf16>
    %37 = vector.shape_cast %36 : vector<1x8x8xbf16> to vector<8x8xbf16>
    %c0_33 = arith.constant 0 : index
    %c0_34 = arith.constant 0 : index
    %c145 = arith.constant 145 : index
    %38 = vector.load %arg1[%c0_33, %c0_34, %c145] : memref<1x8x640xbf16, #tpu.memory_space<vmem>>, vector<1x8x384xbf16>
    %39 = vector.shape_cast %38 : vector<1x8x384xbf16> to vector<8x384xbf16>
    %cst_35 = arith.constant dense<0.000000e+00> : vector<8x384xf32>
    %40 = tpu.matmul %37, %39, %cst_35 {dimension_numbers = #tpu.dot_dimension_numbers<[1], [0], [0], [1], [0, 0, 1, 1], [], []>} : vector<8x8xbf16>, vector<8x384xbf16>, vector<8x384xf32> -> vector<8x384xf32>
    %41 = arith.addf %35, %40 : vector<8x384xf32>
    %c7 = arith.constant 7 : index
    %c0_36 = arith.constant 0 : index
    %c0_37 = arith.constant 0 : index
    %42 = vector.load %arg2[%c7, %c0_36, %c0_37] : memref<9x8x8xbf16, #tpu.memory_space<vmem>>, vector<1x8x8xbf16>
    %43 = vector.shape_cast %42 : vector<1x8x8xbf16> to vector<8x8xbf16>
    %c0_38 = arith.constant 0 : index
    %c0_39 = arith.constant 0 : index
    %c146 = arith.constant 146 : index
    %44 = vector.load %arg1[%c0_38, %c0_39, %c146] : memref<1x8x640xbf16, #tpu.memory_space<vmem>>, vector<1x8x384xbf16>
    %45 = vector.shape_cast %44 : vector<1x8x384xbf16> to vector<8x384xbf16>
    %cst_40 = arith.constant dense<0.000000e+00> : vector<8x384xf32>
    %46 = tpu.matmul %43, %45, %cst_40 {dimension_numbers = #tpu.dot_dimension_numbers<[1], [0], [0], [1], [0, 0, 1, 1], [], []>} : vector<8x8xbf16>, vector<8x384xbf16>, vector<8x384xf32> -> vector<8x384xf32>
    %47 = arith.addf %41, %46 : vector<8x384xf32>
    %c8 = arith.constant 8 : index
    %c0_41 = arith.constant 0 : index
    %c0_42 = arith.constant 0 : index
    %48 = vector.load %arg2[%c8, %c0_41, %c0_42] : memref<9x8x8xbf16, #tpu.memory_space<vmem>>, vector<1x8x8xbf16>
    %49 = vector.shape_cast %48 : vector<1x8x8xbf16> to vector<8x8xbf16>
    %c0_43 = arith.constant 0 : index
    %c0_44 = arith.constant 0 : index
    %c147 = arith.constant 147 : index
    %50 = vector.load %arg1[%c0_43, %c0_44, %c147] : memref<1x8x640xbf16, #tpu.memory_space<vmem>>, vector<1x8x384xbf16>
    %51 = vector.shape_cast %50 : vector<1x8x384xbf16> to vector<8x384xbf16>
    %cst_45 = arith.constant dense<0.000000e+00> : vector<8x384xf32>
    %52 = tpu.matmul %49, %51, %cst_45 {dimension_numbers = #tpu.dot_dimension_numbers<[1], [0], [0], [1], [0, 0, 1, 1], [], []>} : vector<8x8xbf16>, vector<8x384xbf16>, vector<8x384xf32> -> vector<8x384xf32>
    %53 = arith.addf %47, %52 : vector<8x384xf32>
    %54 = vector.broadcast %0 : vector<1x384xf32> to vector<8x384xf32>
    %55 = arith.mulf %53, %54 : vector<8x384xf32>
    %cst_46 = arith.constant dense<0.000000e+00> : vector<8xf32>
    %56 = vector.multi_reduction <add>, %55, %cst_46 [1] : vector<8x384xf32> to vector<8xf32>
    %57 = vector.shape_cast %56 : vector<8xf32> to vector<8x1xf32>
    %cst_47 = arith.constant 3.906250e-03 : f32
    %58 = vector.broadcast %cst_47 : f32 to vector<8x1xf32>
    %59 = arith.mulf %57, %58 : vector<8x1xf32>
    %60 = vector.broadcast %59 : vector<8x1xf32> to vector<8x384xf32>
    %61 = arith.subf %53, %60 : vector<8x384xf32>
    %62 = vector.broadcast %0 : vector<1x384xf32> to vector<8x384xf32>
    %63 = arith.mulf %61, %62 : vector<8x384xf32>
    %64 = arith.mulf %63, %63 : vector<8x384xf32>
    %cst_48 = arith.constant dense<0.000000e+00> : vector<8xf32>
    %65 = vector.multi_reduction <add>, %64, %cst_48 [1] : vector<8x384xf32> to vector<8xf32>
    %66 = vector.shape_cast %65 : vector<8xf32> to vector<8x1xf32>
    %cst_49 = arith.constant 3.906250e-03 : f32
    %67 = vector.broadcast %cst_49 : f32 to vector<8x1xf32>
    %68 = arith.mulf %66, %67 : vector<8x1xf32>
    %cst_50 = arith.constant 9.99999974E-6 : f32
    %69 = vector.broadcast %cst_50 : f32 to vector<8x1xf32>
    %70 = arith.addf %68, %69 : vector<8x1xf32>
    %71 = math.rsqrt %70 : vector<8x1xf32>
    %72 = vector.broadcast %71 : vector<8x1xf32> to vector<8x384xf32>
    %73 = arith.mulf %63, %72 : vector<8x384xf32>
    %cst_51 = arith.constant 0.000000e+00 : f32
    %74 = vector.broadcast %cst_51 : f32 to vector<8x384xf32>
    %75 = arith.cmpf oge, %73, %74 : vector<8x384xf32>
    %cst_52 = arith.constant 0.00999999977 : f32
    %76 = vector.broadcast %cst_52 : f32 to vector<8x384xf32>
    %77 = arith.mulf %76, %73 : vector<8x384xf32>
    %78 = arith.select %75, %73, %77 : vector<8x384xi1>, vector<8x384xf32>
    %cst_53 = arith.constant 0.000000e+00 : bf16
    %79 = vector.broadcast %cst_53 : bf16 to vector<8x128xbf16>
    %c0_54 = arith.constant 0 : index
    %c0_55 = arith.constant 0 : index
    %80 = vector.load %arg6[%c0_54, %c0_55] : memref<8x640xbf16, #tpu.memory_space<vmem>>, vector<8x128xbf16>
    tpu.vector_store %arg6[%c0_54, %c0_55], %79 {strides = array<i32>} : memref<8x640xbf16, #tpu.memory_space<vmem>>, vector<8x128xbf16>,
    %cst_56 = arith.constant 0.000000e+00 : bf16
    %81 = vector.broadcast %cst_56 : bf16 to vector<8x128xbf16>
    %c0_57 = arith.constant 0 : index
    %c512 = arith.constant 512 : index
    %82 = vector.load %arg6[%c0_57, %c512] : memref<8x640xbf16, #tpu.memory_space<vmem>>, vector<8x128xbf16>
    tpu.vector_store %arg6[%c0_57, %c512], %81 {strides = array<i32>} : memref<8x640xbf16, #tpu.memory_space<vmem>>, vector<8x128xbf16>,
    %83 = arith.truncf %78 : vector<8x384xf32> to vector<8x384xbf16>
    %c0_58 = arith.constant 0 : index
    %c128_59 = arith.constant 128 : index
    %84 = vector.load %arg6[%c0_58, %c128_59] : memref<8x640xbf16, #tpu.memory_space<vmem>>, vector<8x384xbf16>
    tpu.vector_store %arg6[%c0_58, %c128_59], %83 {strides = array<i32>} : memref<8x640xbf16, #tpu.memory_space<vmem>>, vector<8x384xbf16>,
    %c0_60 = arith.constant 0 : index
    %c0_61 = arith.constant 0 : index
    %c0_62 = arith.constant 0 : index
    %85 = vector.load %arg3[%c0_60, %c0_61, %c0_62] : memref<9x4x8xbf16, #tpu.memory_space<vmem>>, vector<1x4x8xbf16>
    %86 = vector.shape_cast %85 : vector<1x4x8xbf16> to vector<4x8xbf16>
    %c0_63 = arith.constant 0 : index
    %c109_64 = arith.constant 109 : index
    %87 = vector.load %arg6[%c0_63, %c109_64] : memref<8x640xbf16, #tpu.memory_space<vmem>>, vector<8x384xbf16>
    %cst_65 = arith.constant dense<0.000000e+00> : vector<4x384xf32>
    %88 = tpu.matmul %86, %87, %cst_65 {dimension_numbers = #tpu.dot_dimension_numbers<[1], [0], [0], [1], [0, 0, 1, 1], [], []>} : vector<4x8xbf16>, vector<8x384xbf16>, vector<4x384xf32> -> vector<4x384xf32>
    %c1_66 = arith.constant 1 : index
    %c0_67 = arith.constant 0 : index
    %c0_68 = arith.constant 0 : index
    %89 = vector.load %arg3[%c1_66, %c0_67, %c0_68] : memref<9x4x8xbf16, #tpu.memory_space<vmem>>, vector<1x4x8xbf16>
    %90 = vector.shape_cast %89 : vector<1x4x8xbf16> to vector<4x8xbf16>
    %c0_69 = arith.constant 0 : index
    %c110_70 = arith.constant 110 : index
    %91 = vector.load %arg6[%c0_69, %c110_70] : memref<8x640xbf16, #tpu.memory_space<vmem>>, vector<8x384xbf16>
    %cst_71 = arith.constant dense<0.000000e+00> : vector<4x384xf32>
    %92 = tpu.matmul %90, %91, %cst_71 {dimension_numbers = #tpu.dot_dimension_numbers<[1], [0], [0], [1], [0, 0, 1, 1], [], []>} : vector<4x8xbf16>, vector<8x384xbf16>, vector<4x384xf32> -> vector<4x384xf32>
    %93 = arith.addf %88, %92 : vector<4x384xf32>
    %c2_72 = arith.constant 2 : index
    %c0_73 = arith.constant 0 : index
    %c0_74 = arith.constant 0 : index
    %94 = vector.load %arg3[%c2_72, %c0_73, %c0_74] : memref<9x4x8xbf16, #tpu.memory_space<vmem>>, vector<1x4x8xbf16>
    %95 = vector.shape_cast %94 : vector<1x4x8xbf16> to vector<4x8xbf16>
    %c0_75 = arith.constant 0 : index
    %c111_76 = arith.constant 111 : index
    %96 = vector.load %arg6[%c0_75, %c111_76] : memref<8x640xbf16, #tpu.memory_space<vmem>>, vector<8x384xbf16>
    %cst_77 = arith.constant dense<0.000000e+00> : vector<4x384xf32>
    %97 = tpu.matmul %95, %96, %cst_77 {dimension_numbers = #tpu.dot_dimension_numbers<[1], [0], [0], [1], [0, 0, 1, 1], [], []>} : vector<4x8xbf16>, vector<8x384xbf16>, vector<4x384xf32> -> vector<4x384xf32>
    %98 = arith.addf %93, %97 : vector<4x384xf32>
    %c3_78 = arith.constant 3 : index
    %c0_79 = arith.constant 0 : index
    %c0_80 = arith.constant 0 : index
    %99 = vector.load %arg3[%c3_78, %c0_79, %c0_80] : memref<9x4x8xbf16, #tpu.memory_space<vmem>>, vector<1x4x8xbf16>
    %100 = vector.shape_cast %99 : vector<1x4x8xbf16> to vector<4x8xbf16>
    %c0_81 = arith.constant 0 : index
    %c127_82 = arith.constant 127 : index
    %101 = vector.load %arg6[%c0_81, %c127_82] : memref<8x640xbf16, #tpu.memory_space<vmem>>, vector<8x384xbf16>
    %cst_83 = arith.constant dense<0.000000e+00> : vector<4x384xf32>
    %102 = tpu.matmul %100, %101, %cst_83 {dimension_numbers = #tpu.dot_dimension_numbers<[1], [0], [0], [1], [0, 0, 1, 1], [], []>} : vector<4x8xbf16>, vector<8x384xbf16>, vector<4x384xf32> -> vector<4x384xf32>
    %103 = arith.addf %98, %102 : vector<4x384xf32>
    %c4_84 = arith.constant 4 : index
    %c0_85 = arith.constant 0 : index
    %c0_86 = arith.constant 0 : index
    %104 = vector.load %arg3[%c4_84, %c0_85, %c0_86] : memref<9x4x8xbf16, #tpu.memory_space<vmem>>, vector<1x4x8xbf16>
    %105 = vector.shape_cast %104 : vector<1x4x8xbf16> to vector<4x8xbf16>
    %c0_87 = arith.constant 0 : index
    %c128_88 = arith.constant 128 : index
    %106 = vector.load %arg6[%c0_87, %c128_88] : memref<8x640xbf16, #tpu.memory_space<vmem>>, vector<8x384xbf16>
    %cst_89 = arith.constant dense<0.000000e+00> : vector<4x384xf32>
    %107 = tpu.matmul %105, %106, %cst_89 {dimension_numbers = #tpu.dot_dimension_numbers<[1], [0], [0], [1], [0, 0, 1, 1], [], []>} : vector<4x8xbf16>, vector<8x384xbf16>, vector<4x384xf32> -> vector<4x384xf32>
    %108 = arith.addf %103, %107 : vector<4x384xf32>
    %c5_90 = arith.constant 5 : index
    %c0_91 = arith.constant 0 : index
    %c0_92 = arith.constant 0 : index
    %109 = vector.load %arg3[%c5_90, %c0_91, %c0_92] : memref<9x4x8xbf16, #tpu.memory_space<vmem>>, vector<1x4x8xbf16>
    %110 = vector.shape_cast %109 : vector<1x4x8xbf16> to vector<4x8xbf16>
    %c0_93 = arith.constant 0 : index
    %c129_94 = arith.constant 129 : index
    %111 = vector.load %arg6[%c0_93, %c129_94] : memref<8x640xbf16, #tpu.memory_space<vmem>>, vector<8x384xbf16>
    %cst_95 = arith.constant dense<0.000000e+00> : vector<4x384xf32>
    %112 = tpu.matmul %110, %111, %cst_95 {dimension_numbers = #tpu.dot_dimension_numbers<[1], [0], [0], [1], [0, 0, 1, 1], [], []>} : vector<4x8xbf16>, vector<8x384xbf16>, vector<4x384xf32> -> vector<4x384xf32>
    %113 = arith.addf %108, %112 : vector<4x384xf32>
    %c6_96 = arith.constant 6 : index
    %c0_97 = arith.constant 0 : index
    %c0_98 = arith.constant 0 : index
    %114 = vector.load %arg3[%c6_96, %c0_97, %c0_98] : memref<9x4x8xbf16, #tpu.memory_space<vmem>>, vector<1x4x8xbf16>
    %115 = vector.shape_cast %114 : vector<1x4x8xbf16> to vector<4x8xbf16>
    %c0_99 = arith.constant 0 : index
    %c145_100 = arith.constant 145 : index
    %116 = vector.load %arg6[%c0_99, %c145_100] : memref<8x640xbf16, #tpu.memory_space<vmem>>, vector<8x384xbf16>
    %cst_101 = arith.constant dense<0.000000e+00> : vector<4x384xf32>
    %117 = tpu.matmul %115, %116, %cst_101 {dimension_numbers = #tpu.dot_dimension_numbers<[1], [0], [0], [1], [0, 0, 1, 1], [], []>} : vector<4x8xbf16>, vector<8x384xbf16>, vector<4x384xf32> -> vector<4x384xf32>
    %118 = arith.addf %113, %117 : vector<4x384xf32>
    %c7_102 = arith.constant 7 : index
    %c0_103 = arith.constant 0 : index
    %c0_104 = arith.constant 0 : index
    %119 = vector.load %arg3[%c7_102, %c0_103, %c0_104] : memref<9x4x8xbf16, #tpu.memory_space<vmem>>, vector<1x4x8xbf16>
    %120 = vector.shape_cast %119 : vector<1x4x8xbf16> to vector<4x8xbf16>
    %c0_105 = arith.constant 0 : index
    %c146_106 = arith.constant 146 : index
    %121 = vector.load %arg6[%c0_105, %c146_106] : memref<8x640xbf16, #tpu.memory_space<vmem>>, vector<8x384xbf16>
    %cst_107 = arith.constant dense<0.000000e+00> : vector<4x384xf32>
    %122 = tpu.matmul %120, %121, %cst_107 {dimension_numbers = #tpu.dot_dimension_numbers<[1], [0], [0], [1], [0, 0, 1, 1], [], []>} : vector<4x8xbf16>, vector<8x384xbf16>, vector<4x384xf32> -> vector<4x384xf32>
    %123 = arith.addf %118, %122 : vector<4x384xf32>
    %c8_108 = arith.constant 8 : index
    %c0_109 = arith.constant 0 : index
    %c0_110 = arith.constant 0 : index
    %124 = vector.load %arg3[%c8_108, %c0_109, %c0_110] : memref<9x4x8xbf16, #tpu.memory_space<vmem>>, vector<1x4x8xbf16>
    %125 = vector.shape_cast %124 : vector<1x4x8xbf16> to vector<4x8xbf16>
    %c0_111 = arith.constant 0 : index
    %c147_112 = arith.constant 147 : index
    %126 = vector.load %arg6[%c0_111, %c147_112] : memref<8x640xbf16, #tpu.memory_space<vmem>>, vector<8x384xbf16>
    %cst_113 = arith.constant dense<0.000000e+00> : vector<4x384xf32>
    %127 = tpu.matmul %125, %126, %cst_113 {dimension_numbers = #tpu.dot_dimension_numbers<[1], [0], [0], [1], [0, 0, 1, 1], [], []>} : vector<4x8xbf16>, vector<8x384xbf16>, vector<4x384xf32> -> vector<4x384xf32>
    %128 = arith.addf %123, %127 : vector<4x384xf32>
    %129 = vector.broadcast %0 : vector<1x384xf32> to vector<4x384xf32>
    %130 = arith.mulf %128, %129 : vector<4x384xf32>
    %cst_114 = arith.constant dense<0.000000e+00> : vector<4xf32>
    %131 = vector.multi_reduction <add>, %130, %cst_114 [1] : vector<4x384xf32> to vector<4xf32>
    %132 = vector.shape_cast %131 : vector<4xf32> to vector<4x1xf32>
    %cst_115 = arith.constant 3.906250e-03 : f32
    %133 = vector.broadcast %cst_115 : f32 to vector<4x1xf32>
    %134 = arith.mulf %132, %133 : vector<4x1xf32>
    %135 = vector.broadcast %134 : vector<4x1xf32> to vector<4x384xf32>
    %136 = arith.subf %128, %135 : vector<4x384xf32>
    %137 = vector.broadcast %0 : vector<1x384xf32> to vector<4x384xf32>
    %138 = arith.mulf %136, %137 : vector<4x384xf32>
    %139 = arith.mulf %138, %138 : vector<4x384xf32>
    %cst_116 = arith.constant dense<0.000000e+00> : vector<4xf32>
    %140 = vector.multi_reduction <add>, %139, %cst_116 [1] : vector<4x384xf32> to vector<4xf32>
    %141 = vector.shape_cast %140 : vector<4xf32> to vector<4x1xf32>
    %cst_117 = arith.constant 3.906250e-03 : f32
    %142 = vector.broadcast %cst_117 : f32 to vector<4x1xf32>
    %143 = arith.mulf %141, %142 : vector<4x1xf32>
    %cst_118 = arith.constant 9.99999974E-6 : f32
    %144 = vector.broadcast %cst_118 : f32 to vector<4x1xf32>
    %145 = arith.addf %143, %144 : vector<4x1xf32>
    %146 = math.rsqrt %145 : vector<4x1xf32>
    %147 = vector.broadcast %146 : vector<4x1xf32> to vector<4x384xf32>
    %148 = arith.mulf %138, %147 : vector<4x384xf32>
    %cst_119 = arith.constant 0.000000e+00 : f32
    %149 = vector.broadcast %cst_119 : f32 to vector<4x384xf32>
    %150 = arith.cmpf oge, %148, %149 : vector<4x384xf32>
    %cst_120 = arith.constant 0.00999999977 : f32
    %151 = vector.broadcast %cst_120 : f32 to vector<4x384xf32>
    %152 = arith.mulf %151, %148 : vector<4x384xf32>
    %153 = arith.select %150, %148, %152 : vector<4x384xi1>, vector<4x384xf32>
    %c0_121 = arith.constant 0 : index
    %c0_122 = arith.constant 0 : index
    %c0_123 = arith.constant 0 : index
    %154 = vector.load %arg5[%c0_121, %c0_122, %c0_123] : memref<1x4x384xf32, #tpu.memory_space<vmem>>, vector<1x4x384xf32>
    %155 = vector.shape_cast %154 : vector<1x4x384xf32> to vector<4x384xf32>
    %156 = vector.shape_cast %153 : vector<4x384xf32> to vector<1x4x384xf32>
    tpu.vector_store %arg5[%c0_121, %c0_122, %c0_123], %156 {strides = array<i32>} : memref<1x4x384xf32, #tpu.memory_space<vmem>>, vector<1x4x384xf32>,
    return
  }
  func.func @transform_0(%arg0: i32) -> (i32, i32, i32) {
    %c0_i32 = arith.constant 0 : i32
    %c0_i32_0 = arith.constant 0 : i32
    %c0_i32_1 = arith.constant 0 : i32
    return %arg0, %c0_i32, %c0_i32_0 : i32, i32, i32
  }
  func.func @transform_1(%arg0: i32) -> (i32, i32, i32) {
    %c0_i32 = arith.constant 0 : i32
    %c0_i32_0 = arith.constant 0 : i32
    %c0_i32_1 = arith.constant 0 : i32
    %c0_i32_2 = arith.constant 0 : i32
    return %c0_i32, %c0_i32_0, %c0_i32_1 : i32, i32, i32
  }
  func.func @transform_2(%arg0: i32) -> (i32, i32, i32) {
    %c0_i32 = arith.constant 0 : i32
    %c0_i32_0 = arith.constant 0 : i32
    %c0_i32_1 = arith.constant 0 : i32
    %c0_i32_2 = arith.constant 0 : i32
    return %c0_i32, %c0_i32_0, %c0_i32_1 : i32, i32, i32
  }
  func.func @transform_3(%arg0: i32) -> (i32, i32) {
    %c0_i32 = arith.constant 0 : i32
    %c0_i32_0 = arith.constant 0 : i32
    %c0_i32_1 = arith.constant 0 : i32
    return %c0_i32, %c0_i32_0 : i32, i32
  }
  func.func @transform_4(%arg0: i32) -> (i32, i32, i32) {
    %c0_i32 = arith.constant 0 : i32
    %c0_i32_0 = arith.constant 0 : i32
    %c0_i32_1 = arith.constant 0 : i32
    return %arg0, %c0_i32, %c0_i32_0 : i32, i32, i32
  }
}

</mosaic_0001>

<bundles_post_ra>
// kernel: decoder_layer_forward.1
= control target key start
LH: loop header
LB: loop body
LE: loop exit
PB: predicated region body
PF: predicated region fallthrough
CT: control target
= control target key end

     0   :  { %s1763_s15 = smov 0   ;;  %s2121_s0 = inlined_call_operand.vmem [shape: bf16[2,8,640], index: 0, kind: input, shape index: {}]   ;;  %s2122_s1 = inlined_call_operand.vmem [shape: bf16[9,8,8], index: 1, kind: input, shape index: {}]   ;;  %s2123_s2 = inlined_call_operand.vmem [shape: bf16[9,4,8], index: 2, kind: input, shape index: {}]   ;;  %s2124_s3 = inlined_call_operand.vmem [shape: f32[1,384], index: 3, kind: input, shape index: {}]   ;;  %s2125_s4 = inlined_call_operand.vmem [shape: f32[2,4,384], index: 4, kind: output, shape index: {}]  }
   0x1 LB: > { %s1619_s16 = sadd.s32 4294967295, %s1727_s15   ;;  %p1623_p0 = scmp.ge.s32.totalorder %s1727_s15, 1  ;;  %s1727_s15 = sphi %s1763_s15, %s14_s15  }
   0x2   : > { %p162_p1 = scmp.lt.s32.totalorder %s1727_s15, 3 }
   0x4   : > { %p163_p2 = pnand %p1623_p0, %p162_p1 }
   0x5   : > { %p188_p3 = scmp.lt.s32.totalorder (!%p163_p2), %s1619_s16, 1  ;;  %s1729_s21 = smov (!%p163_p2), 18  }
   0x6   : > { %166 = sbr.rel (%p163_p2) target bundleno = 1334 (0x536), region = 36  ;;  %s1730_s22 = smov (!%p163_p2), 19  }
   0x7   : > { %s1731_s23 = smov (!%p163_p2), 17   ;;  %s1732_s24 = smov (!%p163_p2), 1  }
   0x8   : > { %s1733_s25 = smov (!%p163_p2), 127   ;;  %s1734_s26 = smov (!%p163_p2), 111  }
   0x9   : > { %s1735_s27 = smov (!%p163_p2), 110   ;;  %s1736_s28 = smov (!%p163_p2), 109  }
   0xb   : > { %s2127_s16 = smov (!%p188_p3, %s1619_s16), 1  ;;  %vm288_vm0 = vcmask 154624   ;;  %vm231_vm1 = vcmask 1043456   ;;  %v200_v24 = vld [vmem:[%s2122_s1] sm:$0xf]  ;;  %vm227_vm2 = vcmask 64512  }
   0xc   : > { %s1698_s17 = smul.u32 20, %s2127_s16  ;;  %vm223_vm3 = vcmask 146432   ;;  %v1626_v39 = vld [vmem:[%s2122_s1 + $0x4] sm:$0xf]  ;;  %vm353_vm4 = vcmask 138240   ;;  %vm421_vm5 = vcmask 7168  }
   0xd   : > { %v1633_v56 = vld [vmem:[%s2122_s1 + $0x8] sm:$0xf]  ;;  %vm567_vm6 = vcmask 1039360   ;;  %vm635_vm7 = vcmask 908288   ;;  %vm703_vm8 = vcmask 900096   ;;  %vm771_vm9 = vcmask 891904  }
   0xe   : > { %s1777_s20 = scalar_lea.vmem %s2121_s0, %s1698_s17  ;;  %s1699_s19 = smul.u32 12, %s2127_s16 }
   0xf   : > { %v202_v0 = vld [vmem:[%s1777_s20 + $0x8] sm:$0xff]  ;;  %v201_v1 = vld [vmem:[%s1777_s20] sm:$0xff] }
  0x10   : > { %v209_v2 = vunpack.c.l.b16 %v202_v0  ;;  %v207_v3 = vunpack.c.l.b16 %v201_v1  ;;  %v210_v6 = vunpack.c.h.b16 %v202_v0  ;;  %v208_v7 = vunpack.c.h.b16 %v201_v1  ;;  %v547_v10 = vld [vmem:[%s1777_s20 + $0x4] sm:$0xff]  ;;  %v548_v15 = vld [vmem:[%s1777_s20 + $0xc] sm:$0xff]  ;;  %s197_s30 = scalar_lea.vmem %s2125_s4, %s1699_s19 }
  0x11   : > { %v551_v11 = vunpack.c.l.b16 %v547_v10  ;;  %v552_v12 = vunpack.c.h.b16 %v547_v10  ;;  %v553_v16 = vunpack.c.l.b16 %v548_v15  ;;  %v554_v18 = vunpack.c.h.b16 %v548_v15  ;;  %v482_v46 = vld [vmem:[%s1777_s20 + $0xc] sm:$0xf] }
  0x12   : > { %v213_v4 = vpack.c.b16 %v209_v2, %v209_v2  ;;  %v211_v5 = vpack.c.b16 %v207_v3, %v207_v3  ;;  %v214_v8 = vpack.c.b16 %v210_v6, %v210_v6  ;;  %v212_v9 = vpack.c.b16 %v208_v7, %v208_v7 }
  0x13   : > { %v1797_v13 = vpack.c.b16 %v551_v11, %v551_v11  ;;  %v1799_v14 = vpack.c.b16 %v552_v12, %v552_v12  ;;  %v557_v17 = vpack.c.b16 %v553_v16, %v553_v16  ;;  %v558_v19 = vpack.c.b16 %v554_v18, %v554_v18  ;;  %v1637_v11 = vld [vmem:[%s2122_s1 + $0xc] sm:$0xf] }
  0x14   : > { %219 = vrot.lane.b32.xlu0 %v213_v4, %s1729_s21  ;;  %215 = vrot.lane.b32.xlu1 %v211_v5, %s1729_s21  ;;  %v487_v52 = vunpack.c.l.b16 %v482_v46 }
  0x15   : > { %280 = vrot.lane.b32.xlu2 %v211_v5, %s1730_s22  ;;  %v498_v57 = vsel %vm231_vm1, %v1799_v14, 0  ;;  %v495_v63 = vsel %vm231_vm1, %v1797_v13, 0 }
  0x16   : > { %v490_v58 = vpack.c.b16 %v487_v52, %v487_v52 }
  0x18   : > { %v501_v0 = vsel %vm231_vm1, %v490_v58, 0 }
  0x1c   : > { %221 = vrot.lane.b32.xlu0 %v214_v8, %s1729_s21  ;;  %217 = vrot.lane.b32.xlu1 %v212_v9, %s1729_s21 }
  0x1d   : > { %282 = vrot.lane.b32.xlu2 %v212_v9, %s1730_s22 }
  0x24   : > { %345 = vrot.lane.b32.xlu0 %v211_v5, %s1731_s23  ;;  %347 = vrot.lane.b32.xlu1 %v212_v9, %s1731_s23 }
  0x25   : > { %284 = vrot.lane.b32.xlu2 %v213_v4, %s1730_s22 }
  0x2c   : > { %286 = vrot.lane.b32.xlu0 %v214_v8, %s1730_s22  ;;  %349 = vrot.lane.b32.xlu1 %v213_v4, %s1731_s23 }
  0x2d   : > { %415 = vrot.lane.b32.xlu2 %v212_v9, %s1732_s24 }
  0x34   : > { %417 = vrot.lane.b32.xlu0 %v213_v4, %s1732_s24  ;;  %351 = vrot.lane.b32.xlu1 %v214_v8, %s1731_s23 }
  0x35   : > { %413 = vrot.lane.b32.xlu2 %v211_v5, %s1732_s24 }
  0x3c   : > { %419 = vrot.lane.b32.xlu0 %v214_v8, %s1732_s24  ;;  %559 = vrot.lane.b32.xlu1 %v1797_v13, %s1733_s25 }
  0x3d   : > { %561 = vrot.lane.b32.xlu2 %v1799_v14, %s1733_s25 }
  0x44   : > { %627 = vrot.lane.b32.xlu0 %v1797_v13, %s1734_s26  ;;  %629 = vrot.lane.b32.xlu1 %v1799_v14, %s1734_s26 }
  0x45   : > { %563 = vrot.lane.b32.xlu2 %v557_v17, %s1733_s25 }
  0x4c   : > { %565 = vrot.lane.b32.xlu0 %v558_v19, %s1733_s25  ;;  %631 = vrot.lane.b32.xlu1 %v557_v17, %s1734_s26 }
  0x4d   : > { %697 = vrot.lane.b32.xlu2 %v1799_v14, %s1735_s27 }
  0x54   : > { %699 = vrot.lane.b32.xlu0 %v557_v17, %s1735_s27  ;;  %633 = vrot.lane.b32.xlu1 %v558_v19, %s1734_s26 }
  0x55   : > { %695 = vrot.lane.b32.xlu2 %v1797_v13, %s1735_s27 }
  0x5c   : > { %701 = vrot.lane.b32.xlu0 %v558_v19, %s1735_s27  ;;  %767 = vrot.lane.b32.xlu1 %v557_v17, %s1736_s28 }
  0x5d   : > { %769 = vrot.lane.b32.xlu2 %v558_v19, %s1736_s28 }
  0x64   : > { %765 = vrot.lane.b32.xlu1 %v1799_v14, %s1736_s28  ;;  %763 = vrot.lane.b32.xlu0 %v1797_v13, %s1736_s28 }
  0x6f   : > { %v281_v20 = vpop.permute.xlu2 %280 }
  0x77   : > { %v283_v21 = vpop.permute.xlu2 %282 }
  0x78   : > { %v289_v22 = vsel %vm288_vm0, %v281_v20, %v283_v21 }
  0x79   : > { %v296_v23 = vsel %vm231_vm1, %v289_v22, 0 }
  0x7a   : > { %311 = vmatpush.bf16.msra.mxu3 %v296_v23 }
  0x7d   : > { %1630 = vmatmul.msk.bf16.vlgmr.msra.gmra.mxu3 %vm227_vm2, %v200_v24 }
  0x7f   : > { %v285_v25 = vpop.permute.xlu2 %284 }
  0x80   : > { %v290_v28 = vsel %vm288_vm0, %v283_v21, %v285_v25 }
  0x81   : > { %v299_v34 = vsel %vm231_vm1, %v290_v28, 0 }
  0x86   : > { %v220_v26 = vpop.permute.xlu0 %219  ;;  %v216_v27 = vpop.permute.xlu1 %215 }
  0x87   : > { %v416_v35 = vpop.permute.xlu2 %415 }
  0x8e   : > { %v222_v29 = vpop.permute.xlu0 %221  ;;  %v218_v30 = vpop.permute.xlu1 %217 }
  0x8f   : > { %v224_v31 = vsel %vm223_vm3, %v216_v27, %v218_v30  ;;  %v225_v32 = vsel %vm223_vm3, %v218_v30, %v220_v26  ;;  %v226_v33 = vsel %vm223_vm3, %v220_v26, %v222_v29  ;;  %v414_v44 = vpop.permute.xlu2 %413  ;;  %v1641_v26 = vld [vmem:[%s2122_s1 + $0x10] sm:$0xf]  ;;  %v1645_v27 = vld [vmem:[%s2122_s1 + $0x14] sm:$0xf] }
  0x90   : > { %v233_v36 = vsel %vm231_vm1, %v224_v31, 0  ;;  %v236_v37 = vsel %vm231_vm1, %v225_v32, 0  ;;  %v239_v38 = vsel %vm231_vm1, %v226_v33, 0  ;;  %v422_v45 = vsel %vm421_vm5, %v414_v44, %v416_v35 }
  0x91   : > { %248 = vmatpush.bf16.msra.mxu0 %v233_v36  ;;  %261 = vmatpush.bf16.msra.mxu1 %v236_v37  ;;  %v429_v51 = vsel %vm231_vm1, %v422_v45, 0 }
  0x92   : > { %274 = vmatpush.bf16.msra.mxu2 %v239_v38 }
  0x94   : > { %1627 = vmatmul.msk.bf16.vlgmr.msra.gmra.mxu0 %vm227_vm2, %v1626_v39  ;;  %1628 = vmatmul.msk.bf16.vlgmr.msra.gmra.mxu1 %vm227_vm2, %v1626_v39 }
  0x95   : > { %324 = vmatpush.bf16.msrb.mxu0 %v299_v34  ;;  %1629 = vmatmul.msk.bf16.vlgmr.msra.gmra.mxu2 %vm227_vm2, %v1626_v39 }
  0x96   : > { %v346_v40 = vpop.permute.xlu0 %345  ;;  %v348_v41 = vpop.permute.xlu1 %347 }
  0x97   : > { %v354_v42 = vsel %vm353_vm4, %v346_v40, %v348_v41  ;;  %v562_v55 = vpop.permute.xlu2 %561 }
  0x98   : > { %v361_v43 = vsel %vm231_vm1, %v354_v42, 0 }
  0x99   : > { %376 = vmatpush.bf16.msrb.mxu2 %v361_v43 }
  0x9e   : > { %v287_v47 = vpop.permute.xlu0 %286  ;;  %v350_v48 = vpop.permute.xlu1 %349 }
  0x9f   : > { %v291_v49 = vsel %vm288_vm0, %v285_v25, %v287_v47  ;;  %v355_v50 = vsel %vm353_vm4, %v348_v41, %v350_v48  ;;  %v564_v3 = vpop.permute.xlu2 %563  ;;  %v1649_v41 = vld [vmem:[%s2122_s1 + $0x18] sm:$0xf] }
  0xa0   : > { %v302_v53 = vsel %vm231_vm1, %v291_v49, 0  ;;  %v364_v54 = vsel %vm231_vm1, %v355_v50, 0  ;;  %v569_v10 = vsel %vm567_vm6, %v562_v55, %v564_v3  ;;  %v1653_v49 = vld [vmem:[%s2122_s1 + $0x1c] sm:$0xf]  ;;  %v1657_v50 = vld [vmem:[%s2122_s1 + $0x20] sm:$0xf] }
  0xa1   : > { %337 = vmatpush.bf16.msrb.mxu1 %v302_v53  ;;  %389 = vmatpush.bf16.msrb.mxu3 %v364_v54  ;;  %v578_v12 = vsel %vm231_vm1, %v569_v10, 0 }
  0xa4   : > { %1631 = vmatmul.msk.bf16.vlgmr.msrb.gmra.mxu0 %vm227_vm2, %v200_v24  ;;  %1632 = vmatmul.msk.bf16.vlgmr.msrb.gmra.mxu1 %vm227_vm2, %v200_v24 }
  0xa5   : > { %444 = vmatpush.bf16.msra.mxu1 %v429_v51  ;;  %1634 = vmatmul.msk.bf16.vlgmr.msrb.gmra.mxu2 %vm227_vm2, %v1633_v56 }
  0xa6   : > { %1635 = vmatmul.msk.bf16.vlgmr.msrb.gmra.mxu3 %vm227_vm2, %v1633_v56  ;;  %v418_v59 = vpop.permute.xlu0 %417  ;;  %v352_v60 = vpop.permute.xlu1 %351 }
  0xa7   : > { %v423_v61 = vsel %vm421_vm5, %v416_v35, %v418_v59  ;;  %v356_v62 = vsel %vm353_vm4, %v350_v48, %v352_v60  ;;  %v698_v13 = vpop.permute.xlu2 %697 }
  0xa8   : > { %v432_v1 = vsel %vm231_vm1, %v423_v61, 0  ;;  %v367_v2 = vsel %vm231_vm1, %v356_v62, 0 }
  0xa9   : > { %523 = vmatpush.bf16.msrb.mxu1 %v498_v57  ;;  %402 = vmatpush.bf16.msra.mxu0 %v367_v2 }
  0xaa   : > { %457 = vmatpush.bf16.msra.mxu2 %v432_v1 }
  0xad   : > { %510 = vmatpush.bf16.msrb.mxu0 %v495_v63 }
  0xae   : > { %536 = vmatpush.bf16.msrb.mxu2 %v501_v0  ;;  %v420_v4 = vpop.permute.xlu0 %419  ;;  %v560_v5 = vpop.permute.xlu1 %559 }
  0xaf   : > { %v424_v6 = vsel %vm421_vm5, %v418_v59, %v420_v4  ;;  %v568_v7 = vsel %vm567_vm6, %v560_v5, %v562_v55  ;;  %v696_v18 = vpop.permute.xlu2 %695 }
  0xb0   : > { %v435_v8 = vsel %vm231_vm1, %v424_v6, 0  ;;  %v575_v9 = vsel %vm231_vm1, %v568_v7, 0  ;;  %v704_v25 = vsel %vm703_vm8, %v696_v18, %v698_v13 }
  0xb1   : > { %470 = vmatpush.bf16.msra.mxu3 %v435_v8  ;;  %v711_v28 = vsel %vm231_vm1, %v704_v25, 0 }
  0xb4   : > { %1636 = vmatmul.msk.bf16.vlgmr.msra.gmra.mxu0 %vm227_vm2, %v1633_v56  ;;  %1638 = vmatmul.msk.bf16.vlgmr.msra.gmra.mxu1 %vm227_vm2, %v1637_v11 }
  0xb5   : > { %590 = vmatpush.bf16.msrb.mxu3 %v575_v9  ;;  %1639 = vmatmul.msk.bf16.vlgmr.msra.gmra.mxu2 %vm227_vm2, %v1637_v11 }
  0xb6   : > { %1640 = vmatmul.msk.bf16.vlgmr.msra.gmra.mxu3 %vm227_vm2, %v1637_v11  ;;  %v628_v14 = vpop.permute.xlu0 %627  ;;  %v630_v15 = vpop.permute.xlu1 %629  ;;  %603 = vmatpush.bf16.msra.mxu0 %v578_v12 }
  0xb7   : > { %v636_v16 = vsel %vm635_vm7, %v628_v14, %v630_v15  ;;  %v770_v35 = vpop.permute.xlu2 %769 }
  0xb8   : > { %v643_v17 = vsel %vm231_vm1, %v636_v16, 0 }
  0xb9   : > { %658 = vmatpush.bf16.msra.mxu2 %v643_v17 }
  0xbe   : > { %v566_v19 = vpop.permute.xlu0 %565  ;;  %v632_v20 = vpop.permute.xlu1 %631 }
  0xbf   : > { %v570_v21 = vsel %vm567_vm6, %v564_v3, %v566_v19  ;;  %v637_v22 = vsel %vm635_vm7, %v630_v15, %v632_v20 }
  0xc0   : > { %v581_v23 = vsel %vm231_vm1, %v570_v21, 0  ;;  %v646_v24 = vsel %vm231_vm1, %v637_v22, 0 }
  0xc1   : > { %616 = vmatpush.bf16.msra.mxu1 %v581_v23  ;;  %671 = vmatpush.bf16.msra.mxu3 %v646_v24 }
  0xc4   : > { %1642 = vmatmul.msk.bf16.vlgmr.msrb.gmra.mxu0 %vm227_vm2, %v1641_v26  ;;  %1643 = vmatmul.msk.bf16.vlgmr.msrb.gmra.mxu1 %vm227_vm2, %v1641_v26 }
  0xc5   : > { %1644 = vmatmul.msk.bf16.vlgmr.msrb.gmra.mxu2 %vm227_vm2, %v1641_v26  ;;  %726 = vmatpush.bf16.msrb.mxu1 %v711_v28 }
  0xc6   : > { %1646 = vmatmul.msk.bf16.vlgmr.msrb.gmra.mxu3 %vm227_vm2, %v1645_v27  ;;  %v700_v29 = vpop.permute.xlu0 %699  ;;  %v634_v30 = vpop.permute.xlu1 %633 }
  0xc7   : > { %v705_v31 = vsel %vm703_vm8, %v698_v13, %v700_v29  ;;  %v638_v32 = vsel %vm635_vm7, %v632_v20, %v634_v30 }
  0xc8   : > { %v714_v33 = vsel %vm231_vm1, %v705_v31, 0  ;;  %v649_v34 = vsel %vm231_vm1, %v638_v32, 0 }
  0xc9   : > { %684 = vmatpush.bf16.msrb.mxu0 %v649_v34  ;;  %739 = vmatpush.bf16.msrb.mxu2 %v714_v33 }
  0xce   : > { %v702_v36 = vpop.permute.xlu0 %701  ;;  %v768_v37 = vpop.permute.xlu1 %767 }
  0xcf   : > { %v706_v38 = vsel %vm703_vm8, %v700_v29, %v702_v36  ;;  %v774_v40 = vsel %vm771_vm9, %v768_v37, %v770_v35 }
  0xd0   : > { %v717_v39 = vsel %vm231_vm1, %v706_v38, 0  ;;  %v785_v42 = vsel %vm231_vm1, %v774_v40, 0 }
  0xd1   : > { %752 = vmatpush.bf16.msrb.mxu3 %v717_v39 }
  0xd4   : > { %1647 = vmatmul.msk.bf16.vlgmr.msra.gmra.mxu0 %vm227_vm2, %v1645_v27  ;;  %1648 = vmatmul.msk.bf16.vlgmr.msra.gmra.mxu1 %vm227_vm2, %v1645_v27 }
  0xd5   : > { %1650 = vmatmul.msk.bf16.vlgmr.msra.gmra.mxu2 %vm227_vm2, %v1649_v41 }
  0xd6   : > { %1651 = vmatmul.msk.bf16.vlgmr.msra.gmra.mxu3 %vm227_vm2, %v1649_v41  ;;  %v766_v43 = vpop.permute.xlu1 %765  ;;  %820 = vmatpush.bf16.msra.mxu2 %v785_v42  ;;  %v764_v44 = vpop.permute.xlu0 %763 }
  0xd7   : > { %v773_v45 = vsel %vm771_vm9, %v766_v43, %v768_v37  ;;  %v772_v46 = vsel %vm771_vm9, %v764_v44, %v766_v43 }
  0xd8   : > { %v782_v47 = vsel %vm231_vm1, %v773_v45, 0  ;;  %v779_v48 = vsel %vm231_vm1, %v772_v46, 0 }
  0xd9   : > { %807 = vmatpush.bf16.msra.mxu1 %v782_v47  ;;  %794 = vmatpush.bf16.msra.mxu0 %v779_v48 }
  0xe4   : > { %1652 = vmatmul.msk.bf16.vlgmr.msrb.gmra.mxu0 %vm227_vm2, %v1649_v41  ;;  %1654 = vmatmul.msk.bf16.vlgmr.msrb.gmra.mxu1 %vm227_vm2, %v1653_v49 }
  0xe5   : > { %1655 = vmatmul.msk.bf16.vlgmr.msrb.gmra.mxu2 %vm227_vm2, %v1653_v49 }
  0xe6   : > { %1656 = vmatmul.msk.bf16.vlgmr.msrb.gmra.mxu3 %vm227_vm2, %v1653_v49 }
  0xf4   : > { %1658 = vmatmul.msk.bf16.vlgmr.msra.gmra.mxu0 %vm227_vm2, %v1657_v50  ;;  %1659 = vmatmul.msk.bf16.vlgmr.msra.gmra.mxu1 %vm227_vm2, %v1657_v50 }
  0xf5   : > { %1660 = vmatmul.msk.bf16.vlgmr.msra.gmra.mxu2 %vm227_vm2, %v1657_v50  ;;  %v199_v50 = vld [vmem:[%s2124_s3] sm:$0x7] }
 0x100   : > { %v313_v51 = vpop.f32.mrf.mxu3 }
 0x108   : > { %v315_v52 = vpop.f32.mrf.mxu3 }
 0x111   : > { %v250_v53 = vpop.f32.mrf.mxu0  ;;  %v263_v54 = vpop.f32.mrf.mxu1 }
 0x112   : > { %v314_v55 = vadd.f32 %v313_v51, %v250_v53 }
 0x118   : > { %v276_v56 = vpop.f32.mrf.mxu2 }
 0x119   : > { %v252_v57 = vpop.f32.mrf.mxu0  ;;  %v265_v58 = vpop.f32.mrf.mxu1 }
 0x11a   : > { %v1938_v58 = vperm.slane %v199_v50, 0 }
 0x120   : > { %v278_v59 = vpop.f32.mrf.mxu2 }
 0x121   : > { %v326_v60 = vpop.f32.mrf.mxu0  ;;  %v339_v61 = vpop.f32.mrf.mxu1 }
 0x122   : > { %v327_v62 = vadd.f32 %v326_v60, %v263_v54  ;;  %v340_v63 = vadd.f32 %v339_v61, %v276_v56  ;;  %v1940_v60 = vperm.slane %v199_v50, 1 }
 0x128   : > { %v378_v0 = vpop.f32.mrf.mxu2 }
 0x129   : > { %v391_v1 = vpop.f32.mrf.mxu3  ;;  %v408_v2 = vadd.f32 %v378_v0, %v314_v55  ;;  %v328_v4 = vpop.f32.mrf.mxu0 }
 0x12a   : > { %v409_v3 = vadd.f32 %v391_v1, %v327_v62  ;;  %v341_v5 = vpop.f32.mrf.mxu1  ;;  %v1944_v1 = vperm.slane %v199_v50, 2 }
 0x130   : > { %v380_v6 = vpop.f32.mrf.mxu2 }
 0x131   : > { %v393_v7 = vpop.f32.mrf.mxu3  ;;  %v404_v8 = vpop.f32.mrf.mxu0 }
 0x132   : > { %v446_v9 = vpop.f32.mrf.mxu1  ;;  %v410_v42 = vadd.f32 %v404_v8, %v340_v63 }
 0x133   : > { %v476_v36 = vadd.f32 %v446_v9, %v408_v2 }
 0x138   : > { %v459_v10 = vpop.f32.mrf.mxu2 }
 0x139   : > { %v472_v11 = vpop.f32.mrf.mxu3  ;;  %v406_v12 = vpop.f32.mrf.mxu0  ;;  %v477_v37 = vadd.f32 %v459_v10, %v409_v3 }
 0x13a   : > { %v448_v13 = vpop.f32.mrf.mxu1  ;;  %v478_v45 = vadd.f32 %v472_v11, %v410_v42 }
 0x140   : > { %v461_v14 = vpop.f32.mrf.mxu2 }
 0x141   : > { %v474_v15 = vpop.f32.mrf.mxu3  ;;  %v512_v16 = vpop.f32.mrf.mxu0 }
 0x142   : > { %v525_v17 = vpop.f32.mrf.mxu1  ;;  %v542_v40 = vadd.f32 %v512_v16, %v476_v36 }
 0x143   : > { %v543_v41 = vadd.f32 %v525_v17, %v477_v37 }
 0x148   : > { %v538_v18 = vpop.f32.mrf.mxu2 }
 0x149   : > { %v592_v19 = vpop.f32.mrf.mxu3  ;;  %v514_v20 = vpop.f32.mrf.mxu0  ;;  %v544_v48 = vadd.f32 %v538_v18, %v478_v45 }
 0x14a   : > { %v527_v21 = vpop.f32.mrf.mxu1  ;;  %v622_v43 = vadd.f32 %v592_v19, %v542_v40 }
 0x150   : > { %v540_v22 = vpop.f32.mrf.mxu2 }
 0x151   : > { %v594_v23 = vpop.f32.mrf.mxu3  ;;  %v605_v24 = vpop.f32.mrf.mxu0 }
 0x152   : > { %v618_v25 = vpop.f32.mrf.mxu1  ;;  %v623_v44 = vadd.f32 %v605_v24, %v543_v41  ;;  %v1737_v24 = vmov 0  }
 0x153   : > { %v624_v56 = vadd.f32 %v618_v25, %v544_v48  ;;  %881 = vst [vmem:[#allocation2] sm:$0xf] %v1737_v24 }
 0x154   : > { %882 = vst [vmem:[#allocation2 + $0x10] sm:$0xf] %v1737_v24 }
 0x158   : > { %v660_v26 = vpop.f32.mrf.mxu2 }
 0x159   : > { %v673_v27 = vpop.f32.mrf.mxu3  ;;  %v607_v28 = vpop.f32.mrf.mxu0  ;;  %v690_v46 = vadd.f32 %v660_v26, %v622_v43 }
 0x15a   : > { %v620_v29 = vpop.f32.mrf.mxu1  ;;  %v691_v47 = vadd.f32 %v673_v27, %v623_v44 }
 0x160   : > { %v662_v30 = vpop.f32.mrf.mxu2 }
 0x161   : > { %v675_v31 = vpop.f32.mrf.mxu3  ;;  %v686_v32 = vpop.f32.mrf.mxu0 }
 0x162   : > { %v728_v33 = vpop.f32.mrf.mxu1  ;;  %v692_v61 = vadd.f32 %v686_v32, %v624_v56 }
 0x163   : > { %v758_v52 = vadd.f32 %v728_v33, %v690_v46 }
 0x168   : > { %v741_v34 = vpop.f32.mrf.mxu2 }
 0x169   : > { %v754_v35 = vpop.f32.mrf.mxu3  ;;  %v688_v38 = vpop.f32.mrf.mxu0  ;;  %v759_v53 = vadd.f32 %v741_v34, %v691_v47 }
 0x16a   : > { %v730_v39 = vpop.f32.mrf.mxu1  ;;  %v760_v62 = vadd.f32 %v754_v35, %v692_v61 }
 0x170   : > { %v743_v49 = vpop.f32.mrf.mxu2 }
 0x171   : > { %v756_v51 = vpop.f32.mrf.mxu3  ;;  %v796_v54 = vpop.f32.mrf.mxu0 }
 0x172   : > { %v809_v55 = vpop.f32.mrf.mxu1  ;;  %v826_v57 = vadd.f32 %v796_v54, %v758_v52 }
 0x173   : > { %v827_v59 = vadd.f32 %v809_v55, %v759_v53 }
 0x174   : > { %v836_v63 = vmul.f32 %v1938_v58, %v826_v57 }
 0x175   : > { %v837_v0 = vmul.f32 %v1940_v60, %v827_v59 }
 0x177   : > { %v839_v7 = vadd.f32 %v837_v0, %v836_v63 }
 0x178   : > { %v822_v2 = vpop.f32.mrf.mxu2 }
 0x179   : > { %v828_v3 = vadd.f32 %v822_v2, %v760_v62  ;;  %v798_v4 = vpop.f32.mrf.mxu0 }
 0x17a   : > { %v811_v5 = vpop.f32.mrf.mxu1 }
 0x17b   : > { %v838_v6 = vmul.f32 %v1944_v1, %v828_v3 }
 0x17d   : > { %v840_v8 = vadd.f32 %v839_v7, %v838_v6  ;;  %v1661_v7 = vld [vmem:[%s2123_s2 + $0x2] sm:$0x3] }
 0x17f   : > { %841 = vadd.xlane.f32.xlu2 %v840_v8 }
 0x180   : > { %v824_v9 = vpop.f32.mrf.mxu2 }
 0x1f2   : > { %v842_v10 = vpop.xlane.xlu2 %841 }
 0x1f3   : > { %v843_v11 = vmul.f32 0.00390625, %v842_v10 }
 0x1f5   : > { %v844_v12 = vsub.f32 %v826_v57, %v843_v11  ;;  %v845_v13 = vsub.f32 %v827_v59, %v843_v11  ;;  %v846_v14 = vsub.f32 %v828_v3, %v843_v11 }
 0x1f7   : > { %v847_v15 = vmul.f32 %v844_v12, %v1938_v58  ;;  %v848_v16 = vmul.f32 %v845_v13, %v1940_v60  ;;  %v849_v17 = vmul.f32 %v846_v14, %v1944_v1 }
 0x1f9   : > { %v850_v18 = vmul.f32 %v847_v15, %v847_v15  ;;  %v851_v19 = vmul.f32 %v848_v16, %v848_v16  ;;  %v852_v20 = vmul.f32 %v849_v17, %v849_v17 }
 0x1fb   : > { %v853_v21 = vadd.f32 %v851_v19, %v850_v18 }
 0x1fd   : > { %v854_v22 = vadd.f32 %v853_v21, %v852_v20  ;;  %v887_v21 = vld [vmem:[%s2123_s2] sm:$0x3] }
 0x1ff   : > { %855 = vadd.xlane.f32.xlu0 %v854_v22 }
 0x272   : > { %v856_v23 = vpop.xlane.xlu0 %855 }
 0x273   : > { %v857_v25 = vmul.f32 0.00390625, %v856_v23 }
 0x275   : > { %v858_v26 = vadd.f32 1e-05, %v857_v25 }
 0x277   : > { %1717 = vrsqrt.f32 %v858_v26  ;;  %vm865_vm11 = vweird.f32 %v858_v26 }
 0x27d   : > { %v1718_v27 = vpop.eup %1717 }
 0x27e   : > { %v860_v28 = vmul.f32 %v1718_v27, %v858_v26  ;;  %vm866_vm10 = vweird.f32 %v1718_v27 }
 0x27f   : > { %vm867_vm12 = vmor %vm865_vm11, %vm866_vm10 }
 0x280   : > { %v861_v29 = vmul.f32 %v1718_v27, %v860_v28 }
 0x282   : > { %v862_v30 = vmul.f32 0.5, %v861_v29 }
 0x284   : > { %v863_v31 = vsub.f32 1.5, %v862_v30 }
 0x286   : > { %v864_v32 = vmul.f32 %v1718_v27, %v863_v31 }
 0x288   : > { %v868_v33 = vsel %vm867_vm12, %v1718_v27, %v864_v32 }
 0x289   : > { %v869_v34 = vmul.f32 %v868_v33, %v847_v15  ;;  %v870_v35 = vmul.f32 %v868_v33, %v848_v16  ;;  %v871_v36 = vmul.f32 %v868_v33, %v849_v17 }
 0x28b   : > { %vm872_vm13 = vcmp.ge.f32.partialorder %v869_v34, 0.0  ;;  %vm873_vm14 = vcmp.ge.f32.partialorder %v870_v35, 0.0  ;;  %vm874_vm15 = vcmp.ge.f32.partialorder %v871_v36, 0.0  ;;  %v875_v37 = vmul.f32 0.01, %v869_v34 }
 0x28c   : > { %v876_v38 = vmul.f32 0.01, %v870_v35  ;;  %v877_v39 = vmul.f32 0.01, %v871_v36 }
 0x28d   : > { %v878_v40 = vsel %vm872_vm13, %v869_v34, %v875_v37 }
 0x28e   : > { %v879_v41 = vsel %vm873_vm14, %v870_v35, %v876_v38  ;;  %v880_v42 = vsel %vm874_vm15, %v871_v36, %v877_v39 }
 0x28f   : > { %v883_v43 = vpack.c.bf16 %v879_v41, %v878_v40  ;;  %v884_v44 = vpack.c.bf16 %v880_v42, %v880_v42 }
 0x291   : > { %885 = vst [vmem:[#allocation2 + $0x4] sm:$0xff] %v883_v43  ;;  %v1232_v55 = vunpack.c.l.b16 %v883_v43  ;;  %v1233_v56 = vunpack.c.h.b16 %v883_v43 }
 0x292   : > { %886 = vst [vmem:[#allocation2 + $0xc] sm:$0xf] %v884_v44 }
 0x293   : > { %v1959_v57 = vpack.c.b16 %v1232_v55, %v1232_v55  ;;  %v1961_v59 = vpack.c.b16 %v1233_v56, %v1233_v56 }
 0x295   : > { %v1176_v31 = vsel %vm231_vm1, %v1959_v57, 0 }
 0x298   : > { %v888_v45 = vld [vmem:[#allocation2] sm:$0xff] }
 0x299   : > { %v889_v46 = vld [vmem:[#allocation2 + $0x8] sm:$0xff]  ;;  %v895_v47 = vunpack.c.h.b16 %v888_v45  ;;  %v894_v48 = vunpack.c.l.b16 %v888_v45 }
 0x29a   : > { %v897_v49 = vunpack.c.h.b16 %v889_v46  ;;  %v896_v53 = vunpack.c.l.b16 %v889_v46  ;;  %v1229_v61 = vld [vmem:[#allocation2 + $0xc] sm:$0xff]  ;;  %v1668_v46 = vld [vmem:[%s2123_s2 + $0x4] sm:$0x3] }
 0x29b   : > { %v899_v50 = vpack.c.b16 %v895_v47, %v895_v47  ;;  %v898_v51 = vpack.c.b16 %v894_v48, %v894_v48  ;;  %v1235_v62 = vunpack.c.h.b16 %v1229_v61  ;;  %v1234_v0 = vunpack.c.l.b16 %v1229_v61  ;;  %v1163_v35 = vld [vmem:[#allocation2 + $0xc] sm:$0xf] }
 0x29c   : > { %v901_v52 = vpack.c.b16 %v897_v49, %v897_v49  ;;  %v900_v54 = vpack.c.b16 %v896_v53, %v896_v53  ;;  %v1168_v36 = vunpack.c.l.b16 %v1163_v35  ;;  %v1672_v53 = vld [vmem:[%s2123_s2 + $0x6] sm:$0x3]  ;;  %v1688_v35 = vld [vmem:[%s2123_s2 + $0xe] sm:$0x3] }
 0x29d   : > { %966 = vrot.lane.b32.xlu2 %v899_v50, %s1730_s22  ;;  %902 = vrot.lane.b32.xlu1 %v898_v51, %s1729_s21  ;;  %v1239_v63 = vpack.c.b16 %v1235_v62, %v1235_v62  ;;  %v1238_v2 = vpack.c.b16 %v1234_v0, %v1234_v0 }
 0x29e   : > { %970 = vrot.lane.b32.xlu0 %v901_v52, %s1730_s22  ;;  %v1171_v43 = vpack.c.b16 %v1168_v36, %v1168_v36  ;;  %v1692_v36 = vld [vmem:[%s2123_s2 + $0x10] sm:$0x3] }
 0x2a0   : > { %v1182_v48 = vsel %vm231_vm1, %v1171_v43, 0 }
 0x2a5   : > { %1032 = vrot.lane.b32.xlu2 %v900_v54, %s1731_s23  ;;  %904 = vrot.lane.b32.xlu1 %v899_v50, %s1729_s21 }
 0x2a6   : > { %1034 = vrot.lane.b32.xlu0 %v901_v52, %s1731_s23 }
 0x2ad   : > { %1097 = vrot.lane.b32.xlu2 %v899_v50, %s1732_s24  ;;  %906 = vrot.lane.b32.xlu1 %v900_v54, %s1729_s21 }
 0x2ae   : > { %1099 = vrot.lane.b32.xlu0 %v900_v54, %s1732_s24 }
 0x2b5   : > { %1240 = vrot.lane.b32.xlu2 %v1959_v57, %s1733_s25  ;;  %908 = vrot.lane.b32.xlu1 %v901_v52, %s1729_s21 }
 0x2b6   : > { %1242 = vrot.lane.b32.xlu0 %v1961_v59, %s1733_s25 }
 0x2bd   : > { %1246 = vrot.lane.b32.xlu2 %v1239_v63, %s1733_s25  ;;  %964 = vrot.lane.b32.xlu1 %v898_v51, %s1730_s22 }
 0x2be   : > { %1307 = vrot.lane.b32.xlu0 %v1959_v57, %s1734_s26 }
 0x2c5   : > { %1311 = vrot.lane.b32.xlu2 %v1238_v2, %s1734_s26  ;;  %968 = vrot.lane.b32.xlu1 %v900_v54, %s1730_s22 }
 0x2c6   : > { %1313 = vrot.lane.b32.xlu0 %v1239_v63, %s1734_s26 }
 0x2cd   : > { %1376 = vrot.lane.b32.xlu2 %v1961_v59, %s1735_s27  ;;  %1028 = vrot.lane.b32.xlu1 %v898_v51, %s1731_s23 }
 0x2ce   : > { %1378 = vrot.lane.b32.xlu0 %v1238_v2, %s1735_s27 }
 0x2d5   : > { %1441 = vrot.lane.b32.xlu2 %v1959_v57, %s1736_s28  ;;  %1030 = vrot.lane.b32.xlu1 %v899_v50, %s1731_s23 }
 0x2d6   : > { %1443 = vrot.lane.b32.xlu0 %v1961_v59, %s1736_s28 }
 0x2dd   : > { %1447 = vrot.lane.b32.xlu2 %v1239_v63, %s1736_s28  ;;  %1095 = vrot.lane.b32.xlu1 %v898_v51, %s1732_s24 }
 0x2e5   : > { %1101 = vrot.lane.b32.xlu1 %v901_v52, %s1732_s24  ;;  %v1179_v52 = vsel %vm231_vm1, %v1961_v59, 0 }
 0x2ed   : > { %1244 = vrot.lane.b32.xlu1 %v1238_v2, %s1733_s25 }
 0x2f5   : > { %1309 = vrot.lane.b32.xlu1 %v1961_v59, %s1734_s26  ;;  %v1676_v59 = vld [vmem:[%s2123_s2 + $0x8] sm:$0x3] }
 0x2f7   : > { %v967_v12 = vpop.permute.xlu2 %966 }
 0x2fd   : > { %1374 = vrot.lane.b32.xlu1 %v1959_v57, %s1735_s27 }
 0x2ff   : > { %v1033_v17 = vpop.permute.xlu2 %1032 }
 0x305   : > { %1380 = vrot.lane.b32.xlu1 %v1239_v63, %s1735_s27 }
 0x307   : > { %v1098_v25 = vpop.permute.xlu2 %1097 }
 0x30d   : > { %1445 = vrot.lane.b32.xlu1 %v1238_v2, %s1736_s28 }
 0x30f   : > { %v903_v3 = vpop.permute.xlu1 %902  ;;  %v1241_v34 = vpop.permute.xlu2 %1240 }
 0x310   : > { %v971_v11 = vpop.permute.xlu0 %970 }
 0x317   : > { %v905_v4 = vpop.permute.xlu1 %904  ;;  %v1247_v47 = vpop.permute.xlu2 %1246 }
 0x318   : > { %v910_v5 = vsel %vm223_vm3, %v903_v3, %v905_v4  ;;  %v1035_v16 = vpop.permute.xlu0 %1034 }
 0x319   : > { %v917_v6 = vsel %vm231_vm1, %v910_v5, 0  ;;  %v1038_v23 = vsel %vm353_vm4, %v1033_v17, %v1035_v16 }
 0x31a   : > { %932 = vmatpush.bf16.msra.mxu3 %v917_v6  ;;  %v1049_v30 = vsel %vm231_vm1, %v1038_v23, 0 }
 0x31d   : > { %1662 = vmatmul.msk.bf16.vlgmr.msra.gmra.mxu3 %vm227_vm2, %v1661_v7 }
 0x31f   : > { %v907_v8 = vpop.permute.xlu1 %906  ;;  %v1312_v55 = vpop.permute.xlu2 %1311 }
 0x320   : > { %v911_v9 = vsel %vm223_vm3, %v905_v4, %v907_v8  ;;  %v1100_v22 = vpop.permute.xlu0 %1099 }
 0x321   : > { %v920_v10 = vsel %vm231_vm1, %v911_v9, 0  ;;  %v1104_v37 = vsel %vm421_vm5, %v1098_v25, %v1100_v22 }
 0x322   : > { %945 = vmatpush.bf16.msrb.mxu0 %v920_v10  ;;  %v1113_v44 = vsel %vm231_vm1, %v1104_v37, 0 }
 0x325   : > { %1663 = vmatmul.msk.bf16.vlgmr.msrb.gmra.mxu0 %vm227_vm2, %v1661_v7 }
 0x327   : > { %v909_v13 = vpop.permute.xlu1 %908  ;;  %v1377_v4 = vpop.permute.xlu2 %1376 }
 0x328   : > { %v912_v14 = vsel %vm223_vm3, %v907_v8, %v909_v13  ;;  %v1243_v33 = vpop.permute.xlu0 %1242 }
 0x329   : > { %v923_v15 = vsel %vm231_vm1, %v912_v14, 0  ;;  %v1248_v56 = vsel %vm567_vm6, %v1241_v34, %v1243_v33 }
 0x32a   : > { %958 = vmatpush.bf16.msrb.mxu1 %v923_v15  ;;  %v1255_v63 = vsel %vm231_vm1, %v1248_v56, 0 }
 0x32d   : > { %1664 = vmatmul.msk.bf16.vlgmr.msrb.gmra.mxu1 %vm227_vm2, %v1661_v7 }
 0x32f   : > { %v965_v18 = vpop.permute.xlu1 %964  ;;  %v1442_v16 = vpop.permute.xlu2 %1441 }
 0x330   : > { %v972_v19 = vsel %vm288_vm0, %v965_v18, %v967_v12  ;;  %v1308_v45 = vpop.permute.xlu0 %1307  ;;  %v1680_v18 = vld [vmem:[%s2123_s2 + $0xa] sm:$0x3] }
 0x331   : > { %v979_v20 = vsel %vm231_vm1, %v972_v19, 0 }
 0x332   : > { %994 = vmatpush.bf16.msrb.mxu2 %v979_v20 }
 0x335   : > { %1665 = vmatmul.msk.bf16.vlgmr.msrb.gmra.mxu2 %vm227_vm2, %v887_v21 }
 0x337   : > { %v969_v24 = vpop.permute.xlu1 %968 }
 0x338   : > { %v973_v26 = vsel %vm288_vm0, %v967_v12, %v969_v24  ;;  %v974_v27 = vsel %vm288_vm0, %v969_v24, %v971_v11  ;;  %v1314_v54 = vpop.permute.xlu0 %1313 }
 0x339   : > { %v982_v28 = vsel %vm231_vm1, %v973_v26, 0  ;;  %v985_v29 = vsel %vm231_vm1, %v974_v27, 0  ;;  %v1317_v2 = vsel %vm635_vm7, %v1312_v55, %v1314_v54 }
 0x33a   : > { %1007 = vmatpush.bf16.msrb.mxu3 %v982_v28  ;;  %1020 = vmatpush.bf16.msra.mxu0 %v985_v29  ;;  %v1328_v9 = vsel %vm231_vm1, %v1317_v2, 0  ;;  %v1684_v28 = vld [vmem:[%s2123_s2 + $0xc] sm:$0x3]  ;;  %v1448_v29 = vpop.permute.xlu2 %1447 }
 0x33d   : > { %1666 = vmatmul.msk.bf16.vlgmr.msrb.gmra.mxu3 %vm227_vm2, %v887_v21  ;;  %1667 = vmatmul.msk.bf16.vlgmr.msra.gmra.mxu0 %vm227_vm2, %v887_v21 }
 0x33e   : > { %1084 = vmatpush.bf16.msra.mxu3 %v1049_v30 }
 0x33f   : > { %v1029_v32 = vpop.permute.xlu1 %1028 }
 0x340   : > { %v1379_v0 = vpop.permute.xlu0 %1378 }
 0x342   : > { %1191 = vmatpush.bf16.msrb.mxu3 %v1176_v31 }
 0x347   : > { %v1031_v38 = vpop.permute.xlu1 %1030 }
 0x348   : > { %v1036_v39 = vsel %vm353_vm4, %v1029_v32, %v1031_v38  ;;  %v1037_v40 = vsel %vm353_vm4, %v1031_v38, %v1033_v17  ;;  %v1444_v11 = vpop.permute.xlu0 %1443  ;;  %v1383_v17 = vsel %vm703_vm8, %v1377_v4, %v1379_v0 }
 0x349   : > { %v1043_v41 = vsel %vm231_vm1, %v1036_v39, 0  ;;  %v1046_v42 = vsel %vm231_vm1, %v1037_v40, 0  ;;  %v1449_v19 = vsel %vm771_vm9, %v1442_v16, %v1444_v11  ;;  %v1392_v20 = vsel %vm231_vm1, %v1383_v17, 0 }
 0x34a   : > { %1058 = vmatpush.bf16.msra.mxu1 %v1043_v41  ;;  %1071 = vmatpush.bf16.msra.mxu2 %v1046_v42  ;;  %v1456_v21 = vsel %vm231_vm1, %v1449_v19, 0 }
 0x34d   : > { %1669 = vmatmul.msk.bf16.vlgmr.msra.gmra.mxu1 %vm227_vm2, %v1668_v46  ;;  %1670 = vmatmul.msk.bf16.vlgmr.msra.gmra.mxu2 %vm227_vm2, %v1668_v46 }
 0x34e   : > { %1138 = vmatpush.bf16.msrb.mxu1 %v1113_v44  ;;  %1671 = vmatmul.msk.bf16.vlgmr.msra.gmra.mxu3 %vm227_vm2, %v1668_v46 }
 0x34f   : > { %v1096_v49 = vpop.permute.xlu1 %1095 }
 0x350   : > { %v1103_v50 = vsel %vm421_vm5, %v1096_v49, %v1098_v25 }
 0x351   : > { %v1110_v51 = vsel %vm231_vm1, %v1103_v50, 0 }
 0x352   : > { %1217 = vmatpush.bf16.msra.mxu1 %v1182_v48  ;;  %1125 = vmatpush.bf16.msrb.mxu0 %v1110_v51 }
 0x355   : > { %1673 = vmatmul.msk.bf16.vlgmr.msrb.gmra.mxu0 %vm227_vm2, %v1672_v53 }
 0x356   : > { %1204 = vmatpush.bf16.msra.mxu0 %v1179_v52 }
 0x357   : > { %v1102_v57 = vpop.permute.xlu1 %1101 }
 0x358   : > { %v1105_v61 = vsel %vm421_vm5, %v1100_v22, %v1102_v57 }
 0x359   : > { %v1116_v62 = vsel %vm231_vm1, %v1105_v61, 0 }
 0x35a   : > { %1151 = vmatpush.bf16.msrb.mxu2 %v1116_v62 }
 0x35d   : > { %1674 = vmatmul.msk.bf16.vlgmr.msrb.gmra.mxu1 %vm227_vm2, %v1672_v53  ;;  %1675 = vmatmul.msk.bf16.vlgmr.msrb.gmra.mxu2 %vm227_vm2, %v1672_v53 }
 0x35e   : > { %1270 = vmatpush.bf16.msra.mxu2 %v1255_v63  ;;  %1677 = vmatmul.msk.bf16.vlgmr.msrb.gmra.mxu3 %vm227_vm2, %v1676_v59 }
 0x35f   : > { %v1245_v3 = vpop.permute.xlu1 %1244 }
 0x360   : > { %v1249_v5 = vsel %vm567_vm6, %v1243_v33, %v1245_v3  ;;  %v1250_v6 = vsel %vm567_vm6, %v1245_v3, %v1247_v47 }
 0x361   : > { %v1258_v7 = vsel %vm231_vm1, %v1249_v5, 0  ;;  %v1261_v8 = vsel %vm231_vm1, %v1250_v6, 0 }
 0x362   : > { %1283 = vmatpush.bf16.msra.mxu3 %v1258_v7  ;;  %1296 = vmatpush.bf16.msrb.mxu0 %v1261_v8 }
 0x365   : > { %1678 = vmatmul.msk.bf16.vlgmr.msra.gmra.mxu0 %vm227_vm2, %v1676_v59 }
 0x366   : > { %1363 = vmatpush.bf16.msrb.mxu3 %v1328_v9 }
 0x367   : > { %v1310_v10 = vpop.permute.xlu1 %1309 }
 0x368   : > { %v1315_v12 = vsel %vm635_vm7, %v1308_v45, %v1310_v10  ;;  %v1316_v13 = vsel %vm635_vm7, %v1310_v10, %v1312_v55 }
 0x369   : > { %v1322_v14 = vsel %vm231_vm1, %v1315_v12, 0  ;;  %v1325_v15 = vsel %vm231_vm1, %v1316_v13, 0 }
 0x36a   : > { %1337 = vmatpush.bf16.msrb.mxu1 %v1322_v14  ;;  %1350 = vmatpush.bf16.msrb.mxu2 %v1325_v15 }
 0x36d   : > { %1679 = vmatmul.msk.bf16.vlgmr.msra.gmra.mxu1 %vm227_vm2, %v1676_v59  ;;  %1681 = vmatmul.msk.bf16.vlgmr.msra.gmra.mxu2 %vm227_vm2, %v1680_v18 }
 0x36e   : > { %1682 = vmatmul.msk.bf16.vlgmr.msra.gmra.mxu3 %vm227_vm2, %v1680_v18  ;;  %1417 = vmatpush.bf16.msra.mxu1 %v1392_v20 }
 0x36f   : > { %1471 = vmatpush.bf16.msra.mxu3 %v1456_v21  ;;  %v1375_v22 = vpop.permute.xlu1 %1374 }
 0x370   : > { %v1382_v23 = vsel %vm703_vm8, %v1375_v22, %v1377_v4 }
 0x371   : > { %v1389_v24 = vsel %vm231_vm1, %v1382_v23, 0 }
 0x372   : > { %1404 = vmatpush.bf16.msra.mxu0 %v1389_v24 }
 0x375   : > { %1683 = vmatmul.msk.bf16.vlgmr.msrb.gmra.mxu0 %vm227_vm2, %v1680_v18 }
 0x377   : > { %v1381_v25 = vpop.permute.xlu1 %1380 }
 0x378   : > { %v1384_v26 = vsel %vm703_vm8, %v1379_v0, %v1381_v25 }
 0x379   : > { %v1395_v27 = vsel %vm231_vm1, %v1384_v26, 0 }
 0x37a   : > { %1430 = vmatpush.bf16.msra.mxu2 %v1395_v27 }
 0x37d   : > { %1685 = vmatmul.msk.bf16.vlgmr.msrb.gmra.mxu1 %vm227_vm2, %v1684_v28  ;;  %1686 = vmatmul.msk.bf16.vlgmr.msrb.gmra.mxu2 %vm227_vm2, %v1684_v28 }
 0x37e   : > { %1687 = vmatmul.msk.bf16.vlgmr.msrb.gmra.mxu3 %vm227_vm2, %v1684_v28 }
 0x37f   : > { %v1446_v30 = vpop.permute.xlu1 %1445 }
 0x380   : > { %v1450_v31 = vsel %vm771_vm9, %v1444_v11, %v1446_v30  ;;  %v1451_v32 = vsel %vm771_vm9, %v1446_v30, %v1448_v29 }
 0x381   : > { %v1459_v33 = vsel %vm231_vm1, %v1450_v31, 0  ;;  %v1462_v34 = vsel %vm231_vm1, %v1451_v32, 0 }
 0x382   : > { %1484 = vmatpush.bf16.msrb.mxu0 %v1459_v33  ;;  %1497 = vmatpush.bf16.msrb.mxu1 %v1462_v34 }
 0x385   : > { %1689 = vmatmul.msk.bf16.vlgmr.msra.gmra.mxu0 %vm227_vm2, %v1688_v35 }
 0x38d   : > { %1690 = vmatmul.msk.bf16.vlgmr.msra.gmra.mxu1 %vm227_vm2, %v1688_v35  ;;  %1691 = vmatmul.msk.bf16.vlgmr.msra.gmra.mxu2 %vm227_vm2, %v1688_v35 }
 0x38e   : > { %1693 = vmatmul.msk.bf16.vlgmr.msra.gmra.mxu3 %vm227_vm2, %v1692_v36 }
 0x395   : > { %1694 = vmatmul.msk.bf16.vlgmr.msrb.gmra.mxu0 %vm227_vm2, %v1692_v36 }
 0x39d   : > { %1695 = vmatmul.msk.bf16.vlgmr.msrb.gmra.mxu1 %vm227_vm2, %v1692_v36 }
 0x3a0   : > { %v934_v37 = vpop.f32.mrf.mxu3 }
 0x3a2   : > { %v947_v38 = vpop.f32.mrf.mxu0 }
 0x3a8   : > { %v936_v39 = vpop.f32.mrf.mxu3 }
 0x3aa   : > { %v949_v40 = vpop.f32.mrf.mxu0  ;;  %v960_v41 = vpop.f32.mrf.mxu1 }
 0x3b2   : > { %v962_v42 = vpop.f32.mrf.mxu1 }
 0x3b8   : > { %v996_v43 = vpop.f32.mrf.mxu2 }
 0x3b9   : > { %v997_v44 = vadd.f32 %v996_v43, %v934_v37 }
 0x3ba   : > { %v1022_v45 = vpop.f32.mrf.mxu0 }
 0x3bb   : > { %v1023_v46 = vadd.f32 %v1022_v45, %v960_v41 }
 0x3c0   : > { %v1009_v47 = vpop.f32.mrf.mxu3  ;;  %v998_v48 = vpop.f32.mrf.mxu2 }
 0x3c1   : > { %v1010_v49 = vadd.f32 %v1009_v47, %v947_v38 }
 0x3c2   : > { %v1024_v50 = vpop.f32.mrf.mxu0 }
 0x3c8   : > { %v1011_v51 = vpop.f32.mrf.mxu3 }
 0x3ca   : > { %v1060_v52 = vpop.f32.mrf.mxu1 }
 0x3cb   : > { %v1090_v53 = vadd.f32 %v1060_v52, %v997_v44 }
 0x3d0   : > { %v1073_v54 = vpop.f32.mrf.mxu2 }
 0x3d1   : > { %v1086_v55 = vpop.f32.mrf.mxu3  ;;  %v1091_v21 = vadd.f32 %v1073_v54, %v1010_v49 }
 0x3d2   : > { %v1062_v56 = vpop.f32.mrf.mxu1  ;;  %v1127_v57 = vpop.f32.mrf.mxu0  ;;  %v1092_v31 = vadd.f32 %v1086_v55, %v1023_v46 }
 0x3d3   : > { %v1157_v27 = vadd.f32 %v1127_v57, %v1090_v53 }
 0x3d8   : > { %v1075_v61 = vpop.f32.mrf.mxu2 }
 0x3d9   : > { %v1088_v62 = vpop.f32.mrf.mxu3 }
 0x3da   : > { %v1129_v63 = vpop.f32.mrf.mxu0  ;;  %v1140_v59 = vpop.f32.mrf.mxu1 }
 0x3db   : > { %v1158_v23 = vadd.f32 %v1140_v59, %v1091_v21 }
 0x3e0   : > { %v1153_v0 = vpop.f32.mrf.mxu2 }
 0x3e1   : > { %v1193_v2 = vpop.f32.mrf.mxu3  ;;  %v1159_v35 = vadd.f32 %v1153_v0, %v1092_v31 }
 0x3e2   : > { %v1142_v3 = vpop.f32.mrf.mxu1  ;;  %v1206_v4 = vpop.f32.mrf.mxu0  ;;  %v1223_v29 = vadd.f32 %v1193_v2, %v1157_v27 }
 0x3e3   : > { %v1224_v28 = vadd.f32 %v1206_v4, %v1158_v23 }
 0x3e8   : > { %v1155_v5 = vpop.f32.mrf.mxu2 }
 0x3e9   : > { %v1195_v6 = vpop.f32.mrf.mxu3 }
 0x3ea   : > { %v1208_v7 = vpop.f32.mrf.mxu0  ;;  %v1219_v8 = vpop.f32.mrf.mxu1 }
 0x3eb   : > { %v1225_v41 = vadd.f32 %v1219_v8, %v1159_v35 }
 0x3f0   : > { %v1272_v9 = vpop.f32.mrf.mxu2 }
 0x3f1   : > { %v1285_v10 = vpop.f32.mrf.mxu3  ;;  %v1302_v32 = vadd.f32 %v1272_v9, %v1223_v29 }
 0x3f2   : > { %v1221_v11 = vpop.f32.mrf.mxu1  ;;  %v1298_v12 = vpop.f32.mrf.mxu0  ;;  %v1303_v30 = vadd.f32 %v1285_v10, %v1224_v28 }
 0x3f3   : > { %v1304_v44 = vadd.f32 %v1298_v12, %v1225_v41 }
 0x3f8   : > { %v1274_v13 = vpop.f32.mrf.mxu2 }
 0x3f9   : > { %v1287_v14 = vpop.f32.mrf.mxu3 }
 0x3fa   : > { %v1300_v15 = vpop.f32.mrf.mxu0  ;;  %v1339_v16 = vpop.f32.mrf.mxu1 }
 0x3fb   : > { %v1369_v36 = vadd.f32 %v1339_v16, %v1302_v32 }
 0x400   : > { %v1352_v17 = vpop.f32.mrf.mxu2 }
 0x401   : > { %v1365_v18 = vpop.f32.mrf.mxu3  ;;  %v1370_v33 = vadd.f32 %v1352_v17, %v1303_v30 }
 0x402   : > { %v1341_v19 = vpop.f32.mrf.mxu1  ;;  %v1406_v20 = vpop.f32.mrf.mxu0  ;;  %v1371_v47 = vadd.f32 %v1365_v18, %v1304_v44 }
 0x403   : > { %v1436_v42 = vadd.f32 %v1406_v20, %v1369_v36 }
 0x408   : > { %v1354_v22 = vpop.f32.mrf.mxu2 }
 0x409   : > { %v1367_v24 = vpop.f32.mrf.mxu3 }
 0x40a   : > { %v1408_v25 = vpop.f32.mrf.mxu0  ;;  %v1419_v26 = vpop.f32.mrf.mxu1 }
 0x40b   : > { %v1437_v37 = vadd.f32 %v1419_v26, %v1370_v33 }
 0x410   : > { %v1432_v34 = vpop.f32.mrf.mxu2 }
 0x411   : > { %v1473_v38 = vpop.f32.mrf.mxu3  ;;  %v1438_v50 = vadd.f32 %v1432_v34, %v1371_v47 }
 0x412   : > { %v1421_v39 = vpop.f32.mrf.mxu1  ;;  %v1486_v40 = vpop.f32.mrf.mxu0  ;;  %v1503_v45 = vadd.f32 %v1473_v38, %v1436_v42 }
 0x413   : > { %v1504_v43 = vadd.f32 %v1486_v40, %v1437_v37 }
 0x414   : > { %v1506_v46 = vmul.f32 %v1503_v45, %v1938_v58 }
 0x415   : > { %v1507_v48 = vmul.f32 %v1504_v43, %v1940_v60 }
 0x416   : > { %v1509_v57 = vsel %vm231_vm1, %v1506_v46, 0.0 }
 0x417   : > { %v1510_v55 = vsel %vm231_vm1, %v1507_v48, 0.0 }
 0x418   : > { %v1434_v49 = vpop.f32.mrf.mxu2  ;;  %v1511_v61 = vadd.f32 %v1510_v55, %v1509_v57 }
 0x419   : > { %v1475_v51 = vpop.f32.mrf.mxu3 }
 0x41a   : > { %v1499_v52 = vpop.f32.mrf.mxu1  ;;  %v1488_v53 = vpop.f32.mrf.mxu0 }
 0x41b   : > { %v1505_v54 = vadd.f32 %v1499_v52, %v1438_v50 }
 0x41d   : > { %v1508_v56 = vmul.f32 %v1505_v54, %v1944_v1 }
 0x41f   : > { %v1512_v62 = vsel %vm231_vm1, %v1508_v56, 0.0 }
 0x420   : > { %v1513_v63 = vadd.f32 %v1512_v62, %v1511_v61 }
 0x422   : > { %1514 = vadd.xlane.f32.xlu0 %v1513_v63  ;;  %v1501_v59 = vpop.f32.mrf.mxu1 }
 0x495   : > { %v1515_v0 = vpop.xlane.xlu0 %1514 }
 0x496   : > { %v1516_v2 = vmul.f32 0.00390625, %v1515_v0 }
 0x498   : > { %v1517_v3 = vsub.f32 %v1503_v45, %v1516_v2  ;;  %v1518_v4 = vsub.f32 %v1504_v43, %v1516_v2  ;;  %v1519_v5 = vsub.f32 %v1505_v54, %v1516_v2 }
 0x49a   : > { %v1520_v6 = vmul.f32 %v1517_v3, %v1938_v58  ;;  %v1521_v7 = vmul.f32 %v1518_v4, %v1940_v60  ;;  %v1522_v8 = vmul.f32 %v1519_v5, %v1944_v1 }
 0x49c   : > { %v1523_v9 = vmul.f32 %v1520_v6, %v1520_v6  ;;  %v1524_v10 = vmul.f32 %v1521_v7, %v1521_v7  ;;  %v1525_v11 = vmul.f32 %v1522_v8, %v1522_v8 }
 0x49e   : > { %v1526_v12 = vsel %vm231_vm1, %v1523_v9, 0.0  ;;  %v1527_v13 = vsel %vm231_vm1, %v1524_v10, 0.0  ;;  %v1529_v15 = vsel %vm231_vm1, %v1525_v11, 0.0 }
 0x49f   : > { %v1528_v14 = vadd.f32 %v1527_v13, %v1526_v12 }
 0x4a1   : > { %v1530_v16 = vadd.f32 %v1529_v15, %v1528_v14 }
 0x4a3   : > { %1531 = vadd.xlane.f32.xlu1 %v1530_v16 }
 0x516   : > { %v1532_v17 = vpop.xlane.xlu1 %1531 }
 0x517   : > { %v1533_v18 = vmul.f32 0.00390625, %v1532_v17 }
 0x519   : > { %v1534_v58 = vadd.f32 1e-05, %v1533_v18 }
 0x51b   : > { %1719 = vrsqrt.f32 %v1534_v58  ;;  %vm1541_vm2 = vweird.f32 %v1534_v58 }
 0x521   : > { %v1720_v60 = vpop.eup %1719 }
 0x522   : > { %v1536_v19 = vmul.f32 %v1720_v60, %v1534_v58  ;;  %vm1542_vm0 = vweird.f32 %v1720_v60 }
 0x523   : > { %vm1543_vm3 = vmor %vm1541_vm2, %vm1542_vm0 }
 0x524   : > { %v1537_v1 = vmul.f32 %v1720_v60, %v1536_v19 }
 0x526   : > { %v1538_v20 = vmul.f32 0.5, %v1537_v1 }
 0x528   : > { %v1539_v21 = vsub.f32 1.5, %v1538_v20 }
 0x52a   : > { %v1540_v22 = vmul.f32 %v1720_v60, %v1539_v21 }
 0x52c   : > { %v1544_v23 = vsel %vm1543_vm3, %v1720_v60, %v1540_v22 }
 0x52d   : > { %v1545_v24 = vmul.f32 %v1544_v23, %v1520_v6  ;;  %v1546_v25 = vmul.f32 %v1544_v23, %v1521_v7  ;;  %v1547_v26 = vmul.f32 %v1544_v23, %v1522_v8 }
 0x52f   : > { %vm1549_vm4 = vcmp.ge.f32.partialorder %v1546_v25, 0.0  ;;  %vm1550_vm5 = vcmp.ge.f32.partialorder %v1547_v26, 0.0  ;;  %v1551_v27 = vmul.f32 0.01, %v1545_v24  ;;  %v1552_v28 = vmul.f32 0.01, %v1546_v25 }
 0x530   : > { %v1553_v29 = vmul.f32 0.01, %v1547_v26  ;;  %vm1548_vm6 = vcmp.ge.f32.partialorder %v1545_v24, 0.0 }
 0x531   : > { %v1555_v30 = vsel %vm1549_vm4, %v1546_v25, %v1552_v28  ;;  %v1554_v33 = vsel %vm1548_vm6, %v1545_v24, %v1551_v27 }
 0x532   : > { %v1556_v31 = vsel %vm1550_vm5, %v1547_v26, %v1553_v29  ;;  %v1559_v32 = vrot.slane %v1555_v30, 4 }
 0x533   : > { %1563 = vst [vmem:[%s197_s30 + $0x8] sm:$0xf] %v1556_v31 }
 0x534   : > { %v1560_v34 = vsel %vm231_vm1, %v1554_v33, %v1559_v32 }
 0x535   : > { %1562 = vst [vmem:[%s197_s30] sm:$0xff] %v1560_v34 }
 0x536 PF: > { %s14_s15 = sadd.s32 1, %s1727_s15  }
 0x537   : > { %p11_p4 = scmp.ge.s32.totalorder %s14_s15, 4  }
 0x539   :  { %13 = sbr.rel (!%p11_p4) target bundleno = 1 (0x1), region = 82 }

</bundles_post_ra>
